<compile_context>
chip_gen: v7x
topology: tpu7x:2x2x1
jax: 0.10.0
libtpu: 0.0.40
codegen_flags: <defaults>
</compile_context>

<pallas_src>
import functools

import jax
import jax.numpy as jnp
from jax.experimental import pallas as pl
from jax.experimental.pallas import tpu as pltpu

EPS = 1e-5


def _resblock_kernel(C, H, nb, x_ref,
                     w1_ref, b1_ref, g1_ref, bt1_ref,
                     w2_ref, b2_ref, g2_ref, bt2_ref,
                     avg_ref, o_ref, pad_ref):
    # x_ref  : (nb*H, W*C) f32      lane-dense activation slab (nb images stacked on rows)
    # w*_ref : (W*C, 3*W*C) bf16    three vertical-tap band matrices concatenated on columns
    # b*/g*/bt*: (1, W*C) f32       conv bias / LN gamma / LN beta, pre-tiled over W
    # avg_ref: (W*C, W*C) f32       block-diagonal per-pixel channel-averaging matrix
    # o_ref  : (nb*H, W*C) f32
    # pad_ref: (nb*(H+2), W*C) bf16 per-image vertically zero-padded MXU operand
    WC = x_ref.shape[-1]
    Hp = H + 2

    # Zero only the per-image halo rows (interior rows are always overwritten).
    # Done every step: guarding with pl.program_id(0)==0 would be unsafe when the
    # "parallel" axis is split across TensorCores (a core that never runs step 0
    # would use an uninitialized halo in its private scratch).
    zrow = jnp.zeros((1, WC), pad_ref.dtype)
    for n in range(nb):
        pad_ref[n * Hp:n * Hp + 1, :] = zrow
        pad_ref[n * Hp + H + 1:n * Hp + H + 2, :] = zrow

    avg = avg_ref[...]

    def conv_ln(act, w_ref, b_ref, g_ref, bt_ref, relu):
        # act: (nb*H, WC) f32.  Stage interior rows (bf16) image by image.
        for n in range(nb):
            pad_ref[n * Hp + 1:n * Hp + 1 + H, :] = (
                act[n * H:(n + 1) * H, :].astype(pad_ref.dtype))
        # One wide MXU matmul covering all three vertical taps of all nb images:
        #   (nb*(H+2), WC) @ (WC, 3*WC) -> f32
        P = jnp.dot(pad_ref[...], w_ref[...], preferred_element_type=jnp.float32)
        # Per-image shifted-row combine of the three tap column-blocks.
        ys = []
        for n in range(nb):
            base = n * Hp
            ys.append(P[base:base + H, 0:WC]
                      + P[base + 1:base + H + 1, WC:2 * WC]
                      + P[base + 2:base + H + 2, 2 * WC:3 * WC])
        y = jnp.concatenate(ys, axis=0) + b_ref[...]          # (nb*H, WC) f32
        # LayerNorm over the C channels of each pixel with stats on the MXU:
        # y @ avg broadcasts each pixel's channel mean to all of its lanes, so no
        # lane-segment reshape / cross-lane reduce is needed.  Centered variance.
        mu = jnp.dot(y, avg, preferred_element_type=jnp.float32)
        d = y - mu
        var = jnp.dot(d * d, avg, preferred_element_type=jnp.float32)
        yn = d * jax.lax.rsqrt(var + EPS) * g_ref[...] + bt_ref[...]
        return jnp.maximum(yn, 0.0) if relu else yn

    x = x_ref[...]
    y1 = conv_ln(x, w1_ref, b1_ref, g1_ref, bt1_ref, True)     # conv1 -> LN -> ReLU
    y2 = conv_ln(y1, w2_ref, b2_ref, g2_ref, bt2_ref, False)   # conv2 -> LN
    o_ref[...] = jnp.maximum(y2 + x, 0.0)                      # +residual -> ReLU


def _band_matrices(w_hwio, W):
    """Fold the 3 horizontal taps + horizontal zero-padding of a 3x3 'same' conv into
    three (W*Cin, W*Cout) block-banded matrices (one per vertical tap dy)."""
    _, _, Cin, Cout = w_hwio.shape
    WCi, WCo = W * Cin, W * Cout
    i = jnp.arange(WCi)
    j = jnp.arange(WCo)
    src_w, ci = i // Cin, i % Cin
    dst_w, co = j // Cout, j % Cout
    dx = src_w[:, None] - dst_w[None, :] + 1         # which horizontal tap feeds this entry
    valid = (dx >= 0) & (dx <= 2)
    dxc = jnp.clip(dx, 0, 2)

    def one(dy):
        w_dy = w_hwio[dy]                            # (3, Cin, Cout)
        vals = w_dy[dxc, ci[:, None], co[None, :]]   # (WCi, WCo)
        return jnp.where(valid, vals, 0.0)

    return jnp.stack([one(0), one(1), one(2)], axis=0)  # (3, WCi, WCo)


def _band_cat_matrix(w_hwio, W):
    """(W*C, 3*W*C) bf16: vertical-tap band matrices concatenated along the output axis."""
    wb = _band_matrices(w_hwio, W)
    return jnp.concatenate([wb[0], wb[1], wb[2]], axis=1).astype(jnp.bfloat16)


def _avg_matrix(W, C):
    """(W*C, W*C) f32 block-diagonal matrix: y @ A = per-pixel channel mean broadcast."""
    WC = W * C
    i = jnp.arange(WC)
    same_pixel = (i[:, None] // C) == (i[None, :] // C)
    return jnp.where(same_pixel, 1.0 / C, 0.0).astype(jnp.float32)


def _pick_nb(N, H, target_rows=256, max_rows=512):
    """Batch elements per grid step: aim for nb*H rows >= target (fills the 256-wide
    MXU on v6e/v7x) while keeping >= 2 grid steps when possible (pipeline depth /
    second TensorCore on v7x)."""
    divisors = [d for d in range(1, N + 1) if N % d == 0]
    fitting = [d for d in divisors if d * H <= max_rows] or [1]
    nb = max(fitting)
    smaller = [d for d in fitting if d < N and d * H >= target_rows]
    if nb == N and smaller:
        nb = max(smaller)
    return nb


def resblock_pallas(x_slabs, params, *, H, W, C, nb=None):
    """Fused ResBlock forward on lane-dense slabs.

    x_slabs: (N, H, W*C) float32 channels-last row slabs; returns the same layout.
    (Best efficiency when W*C is a multiple of 128; the test uses W*C = 128.)"""
    N = x_slabs.shape[0]
    WC = W * C
    assert x_slabs.shape == (N, H, WC), x_slabs.shape
    if nb is None:
        nb = _pick_nb(N, H)
    assert N % nb == 0, (N, nb)

    w1c = _band_cat_matrix(params["w1"], W)
    w2c = _band_cat_matrix(params["w2"], W)
    avg = _avg_matrix(W, C)
    tile = lambda v: jnp.tile(v.reshape(1, C), (1, W)).astype(jnp.float32)
    b1t, g1t, bt1t = tile(params["b1"]), tile(params["g1"]), tile(params["bt1"])
    b2t, g2t, bt2t = tile(params["b2"]), tile(params["g2"]), tile(params["bt2"])

    x2 = x_slabs.reshape(N * H, WC)                  # pure leading-dim merge, no relayout

    slab = pl.BlockSpec((nb * H, WC), lambda g: (g, 0))
    wspec = pl.BlockSpec((WC, 3 * WC), lambda g: (0, 0))
    vspec = pl.BlockSpec((1, WC), lambda g: (0, 0))
    aspec = pl.BlockSpec((WC, WC), lambda g: (0, 0))

    grid_spec = pltpu.PrefetchScalarGridSpec(
        num_scalar_prefetch=0,
        grid=(N // nb,),
        in_specs=[slab,
                  wspec, vspec, vspec, vspec,
                  wspec, vspec, vspec, vspec,
                  aspec],
        out_specs=pl.BlockSpec((nb * H, WC), lambda g: (g, 0)),
        scratch_shapes=[pltpu.VMEM((nb * (H + 2), WC), jnp.bfloat16)],
    )

    out = pl.pallas_call(
        functools.partial(_resblock_kernel, C, H, nb),
        out_shape=jax.ShapeDtypeStruct((N * H, WC), jnp.float32),
        grid_spec=grid_spec,
        compiler_params=pltpu.CompilerParams(dimension_semantics=("parallel",)),
    )(x2, w1c, b1t, g1t, bt1t, w2c, b2t, g2t, bt2t, avg)

    return out.reshape(N, H, WC)


def resblock_pallas_nchw(x_nchw, params, nb=None):
    """Drop-in NCHW adapter for module fidelity.
    TODO(synk): keep activations in NHWC / (N,H,W*C) end-to-end in real pipelines --
    these full-tensor relayouts cost more HBM bandwidth than the fused kernel."""
    N, C, H, W = x_nchw.shape
    slabs = jnp.transpose(x_nchw, (0, 2, 3, 1)).reshape(N, H, W * C)
    out = resblock_pallas(slabs, params, H=H, W=W, C=C, nb=nb)
    return jnp.transpose(out.reshape(N, H, W, C), (0, 3, 1, 2))


def resblock_reference_nhwc(x_nhwc, params):
    """Pure-JAX reference with matching semantics (bf16 conv operands, f32 LN), NHWC."""
    def conv_block(h, w, b, g, bt, act):
        y = jax.lax.conv_general_dilated(
            h.astype(jnp.bfloat16), w.astype(jnp.bfloat16),
            window_strides=(1, 1), padding=((1, 1), (1, 1)),
            dimension_numbers=("NHWC", "HWIO", "NHWC"),
            preferred_element_type=jnp.float32) + b
        mu = jnp.mean(y, axis=-1, keepdims=True)
        var = jnp.mean(jnp.square(y - mu), axis=-1, keepdims=True)
        y = (y - mu) * jax.lax.rsqrt(var + EPS) * g + bt
        return jnp.maximum(y, 0.0) if act else y

    y = conv_block(x_nhwc, params["w1"], params["b1"], params["g1"], params["bt1"], True)
    y = conv_block(y, params["w2"], params["b2"], params["g2"], params["bt2"], False)
    return jnp.maximum(y + x_nhwc, 0.0)


def init_params(key, channels):
    ks = jax.random.split(key, 4)
    C = channels
    return {
        "w1": 0.1 * jax.random.normal(ks[0], (3, 3, C, C), jnp.float32),
        "b1": 0.05 * jax.random.normal(ks[1], (1, C), jnp.float32),
        "g1": jnp.ones((1, C), jnp.float32),
        "bt1": jnp.zeros((1, C), jnp.float32),
        "w2": 0.1 * jax.random.normal(ks[2], (3, 3, C, C), jnp.float32),
        "b2": 0.05 * jax.random.normal(ks[3], (1, C), jnp.float32),
        "g2": jnp.ones((1, C), jnp.float32),
        "bt2": jnp.zeros((1, C), jnp.float32),
    }


if __name__ == "__main__":
    key = jax.random.PRNGKey(0)
    k_x, k_p = jax.random.split(key)

    # Small shapes: W*C = 128 (lane-dense); N=8 with nb=4 images per step so each grid
    # step runs a conv matmul with M = nb*(H+2) = 72 and LN matmuls with M = nb*H = 64,
    # over a 2-step "parallel" grid (demonstrates M-growth + pipelining; scale nb/H for
    # production so nb*H >= 256).
    N, C, H, W = 8, 8, 16, 16
    x_nchw = jax.random.normal(k_x, (N, C, H, W), jnp.float32)   # PyTorch-module layout
    params = init_params(k_p, C)

    # Production path keeps activations in (N, H, W*C) slabs end-to-end; the NCHW->NHWC
    # conversion lives only at the test-harness boundary (see resblock_pallas_nchw).
    x_nhwc = jnp.transpose(x_nchw, (0, 2, 3, 1))
    x_slabs = x_nhwc.reshape(N, H, W * C)

    out = jax.block_until_ready(resblock_pallas(x_slabs, params, H=H, W=W, C=C, nb=4))
    ref = jax.block_until_ready(resblock_reference_nhwc(x_nhwc, params)).reshape(N, H, W * C)

    assert out.shape == (N, H, W * C), out.shape
    max_err = float(jnp.max(jnp.abs(out - ref)))
    # bf16 conv operands in both paths; the kernel additionally computes LN stats via
    # MXU matmuls (f32 operands, which may run at reduced-precision MXU passes), so the
    # tolerance is slightly looser than a pure f32-reduce LN would need.
    assert jnp.allclose(out, ref, rtol=2e-2, atol=2e-2), max_err
    print("KERNEL_OK")
</pallas_src>

<mosaic_0001>
module attributes {stable_mosaic.version = 11 : i64} {
  func.func @_resblock_kernel(%arg0: i32, %arg1: memref<64x128xf32, #tpu.memory_space<vmem>>, %arg2: memref<128x384xbf16, #tpu.memory_space<vmem>>, %arg3: memref<1x128xf32, #tpu.memory_space<vmem>>, %arg4: memref<1x128xf32, #tpu.memory_space<vmem>>, %arg5: memref<1x128xf32, #tpu.memory_space<vmem>>, %arg6: memref<128x384xbf16, #tpu.memory_space<vmem>>, %arg7: memref<1x128xf32, #tpu.memory_space<vmem>>, %arg8: memref<1x128xf32, #tpu.memory_space<vmem>>, %arg9: memref<1x128xf32, #tpu.memory_space<vmem>>, %arg10: memref<128x128xf32, #tpu.memory_space<vmem>>, %arg11: memref<64x128xf32, #tpu.memory_space<vmem>>, %arg12: memref<72x128xbf16, #tpu.memory_space<vmem>>) attributes {dimension_semantics = [#tpu.dimension_semantics<parallel>], iteration_bounds = array<i64: 2>, scalar_prefetch = 0 : i64, scratch_operands = 1 : i64, tpu.core_type = #tpu.core_type<tc>, window_params = [{transform_indices = @transform_0, window_bounds = array<i64: 64, 128>}, {pipeline_mode = #tpu.pipeline_mode<synchronous>, transform_indices = @transform_1, window_bounds = array<i64: 128, 384>}, {pipeline_mode = #tpu.pipeline_mode<synchronous>, transform_indices = @transform_2, window_bounds = array<i64: 1, 128>}, {pipeline_mode = #tpu.pipeline_mode<synchronous>, transform_indices = @transform_3, window_bounds = array<i64: 1, 128>}, {pipeline_mode = #tpu.pipeline_mode<synchronous>, transform_indices = @transform_4, window_bounds = array<i64: 1, 128>}, {pipeline_mode = #tpu.pipeline_mode<synchronous>, transform_indices = @transform_5, window_bounds = array<i64: 128, 384>}, {pipeline_mode = #tpu.pipeline_mode<synchronous>, transform_indices = @transform_6, window_bounds = array<i64: 1, 128>}, {pipeline_mode = #tpu.pipeline_mode<synchronous>, transform_indices = @transform_7, window_bounds = array<i64: 1, 128>}, {pipeline_mode = #tpu.pipeline_mode<synchronous>, transform_indices = @transform_8, window_bounds = array<i64: 1, 128>}, {pipeline_mode = #tpu.pipeline_mode<synchronous>, transform_indices = @transform_9, window_bounds = array<i64: 128, 128>}, {transform_indices = @transform_10, window_bounds = array<i64: 64, 128>}]} {
    %cst = arith.constant 0.000000e+00 : bf16
    %0 = vector.broadcast %cst : bf16 to vector<1x128xbf16>
    %c0 = arith.constant 0 : index
    %c0_0 = arith.constant 0 : index
    %1 = vector.load %arg12[%c0, %c0_0] : memref<72x128xbf16, #tpu.memory_space<vmem>>, vector<1x128xbf16>
    tpu.vector_store %arg12[%c0, %c0_0], %0 {strides = array<i32>} : memref<72x128xbf16, #tpu.memory_space<vmem>>, vector<1x128xbf16>,
    %c17 = arith.constant 17 : index
    %c0_1 = arith.constant 0 : index
    %2 = vector.load %arg12[%c17, %c0_1] : memref<72x128xbf16, #tpu.memory_space<vmem>>, vector<1x128xbf16>
    tpu.vector_store %arg12[%c17, %c0_1], %0 {strides = array<i32>} : memref<72x128xbf16, #tpu.memory_space<vmem>>, vector<1x128xbf16>,
    %c18 = arith.constant 18 : index
    %c0_2 = arith.constant 0 : index
    %3 = vector.load %arg12[%c18, %c0_2] : memref<72x128xbf16, #tpu.memory_space<vmem>>, vector<1x128xbf16>
    tpu.vector_store %arg12[%c18, %c0_2], %0 {strides = array<i32>} : memref<72x128xbf16, #tpu.memory_space<vmem>>, vector<1x128xbf16>,
    %c35 = arith.constant 35 : index
    %c0_3 = arith.constant 0 : index
    %4 = vector.load %arg12[%c35, %c0_3] : memref<72x128xbf16, #tpu.memory_space<vmem>>, vector<1x128xbf16>
    tpu.vector_store %arg12[%c35, %c0_3], %0 {strides = array<i32>} : memref<72x128xbf16, #tpu.memory_space<vmem>>, vector<1x128xbf16>,
    %c36 = arith.constant 36 : index
    %c0_4 = arith.constant 0 : index
    %5 = vector.load %arg12[%c36, %c0_4] : memref<72x128xbf16, #tpu.memory_space<vmem>>, vector<1x128xbf16>
    tpu.vector_store %arg12[%c36, %c0_4], %0 {strides = array<i32>} : memref<72x128xbf16, #tpu.memory_space<vmem>>, vector<1x128xbf16>,
    %c53 = arith.constant 53 : index
    %c0_5 = arith.constant 0 : index
    %6 = vector.load %arg12[%c53, %c0_5] : memref<72x128xbf16, #tpu.memory_space<vmem>>, vector<1x128xbf16>
    tpu.vector_store %arg12[%c53, %c0_5], %0 {strides = array<i32>} : memref<72x128xbf16, #tpu.memory_space<vmem>>, vector<1x128xbf16>,
    %c54 = arith.constant 54 : index
    %c0_6 = arith.constant 0 : index
    %7 = vector.load %arg12[%c54, %c0_6] : memref<72x128xbf16, #tpu.memory_space<vmem>>, vector<1x128xbf16>
    tpu.vector_store %arg12[%c54, %c0_6], %0 {strides = array<i32>} : memref<72x128xbf16, #tpu.memory_space<vmem>>, vector<1x128xbf16>,
    %c71 = arith.constant 71 : index
    %c0_7 = arith.constant 0 : index
    %8 = vector.load %arg12[%c71, %c0_7] : memref<72x128xbf16, #tpu.memory_space<vmem>>, vector<1x128xbf16>
    tpu.vector_store %arg12[%c71, %c0_7], %0 {strides = array<i32>} : memref<72x128xbf16, #tpu.memory_space<vmem>>, vector<1x128xbf16>,
    %c0_8 = arith.constant 0 : index
    %c0_9 = arith.constant 0 : index
    %9 = vector.load %arg10[%c0_8, %c0_9] : memref<128x128xf32, #tpu.memory_space<vmem>>, vector<128x128xf32>
    %c0_10 = arith.constant 0 : index
    %c0_11 = arith.constant 0 : index
    %10 = vector.load %arg1[%c0_10, %c0_11] : memref<64x128xf32, #tpu.memory_space<vmem>>, vector<64x128xf32>
    %11 = vector.extract_strided_slice %10 {offsets = [0, 0], sizes = [16, 128], strides = [1, 1]} : vector<64x128xf32> to vector<16x128xf32>
    %12 = arith.truncf %11 : vector<16x128xf32> to vector<16x128xbf16>
    %c1 = arith.constant 1 : index
    %c0_12 = arith.constant 0 : index
    %13 = vector.load %arg12[%c1, %c0_12] : memref<72x128xbf16, #tpu.memory_space<vmem>>, vector<16x128xbf16>
    tpu.vector_store %arg12[%c1, %c0_12], %12 {strides = array<i32>} : memref<72x128xbf16, #tpu.memory_space<vmem>>, vector<16x128xbf16>,
    %14 = vector.extract_strided_slice %10 {offsets = [16, 0], sizes = [16, 128], strides = [1, 1]} : vector<64x128xf32> to vector<16x128xf32>
    %15 = arith.truncf %14 : vector<16x128xf32> to vector<16x128xbf16>
    %c19 = arith.constant 19 : index
    %c0_13 = arith.constant 0 : index
    %16 = vector.load %arg12[%c19, %c0_13] : memref<72x128xbf16, #tpu.memory_space<vmem>>, vector<16x128xbf16>
    tpu.vector_store %arg12[%c19, %c0_13], %15 {strides = array<i32>} : memref<72x128xbf16, #tpu.memory_space<vmem>>, vector<16x128xbf16>,
    %17 = vector.extract_strided_slice %10 {offsets = [32, 0], sizes = [16, 128], strides = [1, 1]} : vector<64x128xf32> to vector<16x128xf32>
    %18 = arith.truncf %17 : vector<16x128xf32> to vector<16x128xbf16>
    %c37 = arith.constant 37 : index
    %c0_14 = arith.constant 0 : index
    %19 = vector.load %arg12[%c37, %c0_14] : memref<72x128xbf16, #tpu.memory_space<vmem>>, vector<16x128xbf16>
    tpu.vector_store %arg12[%c37, %c0_14], %18 {strides = array<i32>} : memref<72x128xbf16, #tpu.memory_space<vmem>>, vector<16x128xbf16>,
    %20 = vector.extract_strided_slice %10 {offsets = [48, 0], sizes = [16, 128], strides = [1, 1]} : vector<64x128xf32> to vector<16x128xf32>
    %21 = arith.truncf %20 : vector<16x128xf32> to vector<16x128xbf16>
    %c55 = arith.constant 55 : index
    %c0_15 = arith.constant 0 : index
    %22 = vector.load %arg12[%c55, %c0_15] : memref<72x128xbf16, #tpu.memory_space<vmem>>, vector<16x128xbf16>
    tpu.vector_store %arg12[%c55, %c0_15], %21 {strides = array<i32>} : memref<72x128xbf16, #tpu.memory_space<vmem>>, vector<16x128xbf16>,
    %c0_16 = arith.constant 0 : index
    %c0_17 = arith.constant 0 : index
    %23 = vector.load %arg12[%c0_16, %c0_17] : memref<72x128xbf16, #tpu.memory_space<vmem>>, vector<72x128xbf16>
    %c0_18 = arith.constant 0 : index
    %c0_19 = arith.constant 0 : index
    %24 = vector.load %arg2[%c0_18, %c0_19] : memref<128x384xbf16, #tpu.memory_space<vmem>>, vector<128x384xbf16>
    %cst_20 = arith.constant dense<0.000000e+00> : vector<72x384xf32>
    %25 = tpu.matmul %23, %24, %cst_20 {dimension_numbers = #tpu.dot_dimension_numbers<[1], [0], [0], [1], [0, 0, 1, 1], [], []>} : vector<72x128xbf16>, vector<128x384xbf16>, vector<72x384xf32> -> vector<72x384xf32>
    %26 = vector.extract_strided_slice %25 {offsets = [0, 0], sizes = [16, 128], strides = [1, 1]} : vector<72x384xf32> to vector<16x128xf32>
    %27 = vector.extract_strided_slice %25 {offsets = [1, 128], sizes = [16, 128], strides = [1, 1]} : vector<72x384xf32> to vector<16x128xf32>
    %28 = arith.addf %26, %27 : vector<16x128xf32>
    %29 = vector.extract_strided_slice %25 {offsets = [2, 256], sizes = [16, 128], strides = [1, 1]} : vector<72x384xf32> to vector<16x128xf32>
    %30 = arith.addf %28, %29 : vector<16x128xf32>
    %31 = vector.extract_strided_slice %25 {offsets = [18, 0], sizes = [16, 128], strides = [1, 1]} : vector<72x384xf32> to vector<16x128xf32>
    %32 = vector.extract_strided_slice %25 {offsets = [19, 128], sizes = [16, 128], strides = [1, 1]} : vector<72x384xf32> to vector<16x128xf32>
    %33 = arith.addf %31, %32 : vector<16x128xf32>
    %34 = vector.extract_strided_slice %25 {offsets = [20, 256], sizes = [16, 128], strides = [1, 1]} : vector<72x384xf32> to vector<16x128xf32>
    %35 = arith.addf %33, %34 : vector<16x128xf32>
    %36 = vector.extract_strided_slice %25 {offsets = [36, 0], sizes = [16, 128], strides = [1, 1]} : vector<72x384xf32> to vector<16x128xf32>
    %37 = vector.extract_strided_slice %25 {offsets = [37, 128], sizes = [16, 128], strides = [1, 1]} : vector<72x384xf32> to vector<16x128xf32>
    %38 = arith.addf %36, %37 : vector<16x128xf32>
    %39 = vector.extract_strided_slice %25 {offsets = [38, 256], sizes = [16, 128], strides = [1, 1]} : vector<72x384xf32> to vector<16x128xf32>
    %40 = arith.addf %38, %39 : vector<16x128xf32>
    %41 = vector.extract_strided_slice %25 {offsets = [54, 0], sizes = [16, 128], strides = [1, 1]} : vector<72x384xf32> to vector<16x128xf32>
    %42 = vector.extract_strided_slice %25 {offsets = [55, 128], sizes = [16, 128], strides = [1, 1]} : vector<72x384xf32> to vector<16x128xf32>
    %43 = arith.addf %41, %42 : vector<16x128xf32>
    %44 = vector.extract_strided_slice %25 {offsets = [56, 256], sizes = [16, 128], strides = [1, 1]} : vector<72x384xf32> to vector<16x128xf32>
    %45 = arith.addf %43, %44 : vector<16x128xf32>
    %46 = tpu.concatenate %30, %35, %40, %45 in 0 : vector<16x128xf32>, vector<16x128xf32>, vector<16x128xf32>, vector<16x128xf32> -> vector<64x128xf32>
    %c0_21 = arith.constant 0 : index
    %c0_22 = arith.constant 0 : index
    %47 = vector.load %arg3[%c0_21, %c0_22] : memref<1x128xf32, #tpu.memory_space<vmem>>, vector<1x128xf32>
    %48 = vector.broadcast %47 : vector<1x128xf32> to vector<64x128xf32>
    %49 = arith.addf %46, %48 : vector<64x128xf32>
    %cst_23 = arith.constant dense<0.000000e+00> : vector<64x128xf32>
    %50 = tpu.matmul %49, %9, %cst_23 {dimension_numbers = #tpu.dot_dimension_numbers<[1], [0], [0], [1], [0, 0, 1, 1], [], []>} : vector<64x128xf32>, vector<128x128xf32>, vector<64x128xf32> -> vector<64x128xf32>
    %51 = arith.subf %49, %50 : vector<64x128xf32>
    %52 = arith.mulf %51, %51 : vector<64x128xf32>
    %cst_24 = arith.constant dense<0.000000e+00> : vector<64x128xf32>
    %53 = tpu.matmul %52, %9, %cst_24 {dimension_numbers = #tpu.dot_dimension_numbers<[1], [0], [0], [1], [0, 0, 1, 1], [], []>} : vector<64x128xf32>, vector<128x128xf32>, vector<64x128xf32> -> vector<64x128xf32>
    %cst_25 = arith.constant 9.99999974E-6 : f32
    %54 = vector.broadcast %cst_25 : f32 to vector<64x128xf32>
    %55 = arith.addf %53, %54 : vector<64x128xf32>
    %56 = math.rsqrt %55 : vector<64x128xf32>
    %57 = arith.mulf %51, %56 : vector<64x128xf32>
    %c0_26 = arith.constant 0 : index
    %c0_27 = arith.constant 0 : index
    %58 = vector.load %arg4[%c0_26, %c0_27] : memref<1x128xf32, #tpu.memory_space<vmem>>, vector<1x128xf32>
    %59 = vector.broadcast %58 : vector<1x128xf32> to vector<64x128xf32>
    %60 = arith.mulf %57, %59 : vector<64x128xf32>
    %c0_28 = arith.constant 0 : index
    %c0_29 = arith.constant 0 : index
    %61 = vector.load %arg5[%c0_28, %c0_29] : memref<1x128xf32, #tpu.memory_space<vmem>>, vector<1x128xf32>
    %62 = vector.broadcast %61 : vector<1x128xf32> to vector<64x128xf32>
    %63 = arith.addf %60, %62 : vector<64x128xf32>
    %cst_30 = arith.constant 0.000000e+00 : f32
    %64 = vector.broadcast %cst_30 : f32 to vector<64x128xf32>
    %65 = arith.maximumf %63, %64 : vector<64x128xf32>
    %66 = vector.extract_strided_slice %65 {offsets = [0, 0], sizes = [16, 128], strides = [1, 1]} : vector<64x128xf32> to vector<16x128xf32>
    %67 = arith.truncf %66 : vector<16x128xf32> to vector<16x128xbf16>
    %c1_31 = arith.constant 1 : index
    %c0_32 = arith.constant 0 : index
    %68 = vector.load %arg12[%c1_31, %c0_32] : memref<72x128xbf16, #tpu.memory_space<vmem>>, vector<16x128xbf16>
    tpu.vector_store %arg12[%c1_31, %c0_32], %67 {strides = array<i32>} : memref<72x128xbf16, #tpu.memory_space<vmem>>, vector<16x128xbf16>,
    %69 = vector.extract_strided_slice %65 {offsets = [16, 0], sizes = [16, 128], strides = [1, 1]} : vector<64x128xf32> to vector<16x128xf32>
    %70 = arith.truncf %69 : vector<16x128xf32> to vector<16x128xbf16>
    %c19_33 = arith.constant 19 : index
    %c0_34 = arith.constant 0 : index
    %71 = vector.load %arg12[%c19_33, %c0_34] : memref<72x128xbf16, #tpu.memory_space<vmem>>, vector<16x128xbf16>
    tpu.vector_store %arg12[%c19_33, %c0_34], %70 {strides = array<i32>} : memref<72x128xbf16, #tpu.memory_space<vmem>>, vector<16x128xbf16>,
    %72 = vector.extract_strided_slice %65 {offsets = [32, 0], sizes = [16, 128], strides = [1, 1]} : vector<64x128xf32> to vector<16x128xf32>
    %73 = arith.truncf %72 : vector<16x128xf32> to vector<16x128xbf16>
    %c37_35 = arith.constant 37 : index
    %c0_36 = arith.constant 0 : index
    %74 = vector.load %arg12[%c37_35, %c0_36] : memref<72x128xbf16, #tpu.memory_space<vmem>>, vector<16x128xbf16>
    tpu.vector_store %arg12[%c37_35, %c0_36], %73 {strides = array<i32>} : memref<72x128xbf16, #tpu.memory_space<vmem>>, vector<16x128xbf16>,
    %75 = vector.extract_strided_slice %65 {offsets = [48, 0], sizes = [16, 128], strides = [1, 1]} : vector<64x128xf32> to vector<16x128xf32>
    %76 = arith.truncf %75 : vector<16x128xf32> to vector<16x128xbf16>
    %c55_37 = arith.constant 55 : index
    %c0_38 = arith.constant 0 : index
    %77 = vector.load %arg12[%c55_37, %c0_38] : memref<72x128xbf16, #tpu.memory_space<vmem>>, vector<16x128xbf16>
    tpu.vector_store %arg12[%c55_37, %c0_38], %76 {strides = array<i32>} : memref<72x128xbf16, #tpu.memory_space<vmem>>, vector<16x128xbf16>,
    %c0_39 = arith.constant 0 : index
    %c0_40 = arith.constant 0 : index
    %78 = vector.load %arg12[%c0_39, %c0_40] : memref<72x128xbf16, #tpu.memory_space<vmem>>, vector<72x128xbf16>
    %c0_41 = arith.constant 0 : index
    %c0_42 = arith.constant 0 : index
    %79 = vector.load %arg6[%c0_41, %c0_42] : memref<128x384xbf16, #tpu.memory_space<vmem>>, vector<128x384xbf16>
    %cst_43 = arith.constant dense<0.000000e+00> : vector<72x384xf32>
    %80 = tpu.matmul %78, %79, %cst_43 {dimension_numbers = #tpu.dot_dimension_numbers<[1], [0], [0], [1], [0, 0, 1, 1], [], []>} : vector<72x128xbf16>, vector<128x384xbf16>, vector<72x384xf32> -> vector<72x384xf32>
    %81 = vector.extract_strided_slice %80 {offsets = [0, 0], sizes = [16, 128], strides = [1, 1]} : vector<72x384xf32> to vector<16x128xf32>
    %82 = vector.extract_strided_slice %80 {offsets = [1, 128], sizes = [16, 128], strides = [1, 1]} : vector<72x384xf32> to vector<16x128xf32>
    %83 = arith.addf %81, %82 : vector<16x128xf32>
    %84 = vector.extract_strided_slice %80 {offsets = [2, 256], sizes = [16, 128], strides = [1, 1]} : vector<72x384xf32> to vector<16x128xf32>
    %85 = arith.addf %83, %84 : vector<16x128xf32>
    %86 = vector.extract_strided_slice %80 {offsets = [18, 0], sizes = [16, 128], strides = [1, 1]} : vector<72x384xf32> to vector<16x128xf32>
    %87 = vector.extract_strided_slice %80 {offsets = [19, 128], sizes = [16, 128], strides = [1, 1]} : vector<72x384xf32> to vector<16x128xf32>
    %88 = arith.addf %86, %87 : vector<16x128xf32>
    %89 = vector.extract_strided_slice %80 {offsets = [20, 256], sizes = [16, 128], strides = [1, 1]} : vector<72x384xf32> to vector<16x128xf32>
    %90 = arith.addf %88, %89 : vector<16x128xf32>
    %91 = vector.extract_strided_slice %80 {offsets = [36, 0], sizes = [16, 128], strides = [1, 1]} : vector<72x384xf32> to vector<16x128xf32>
    %92 = vector.extract_strided_slice %80 {offsets = [37, 128], sizes = [16, 128], strides = [1, 1]} : vector<72x384xf32> to vector<16x128xf32>
    %93 = arith.addf %91, %92 : vector<16x128xf32>
    %94 = vector.extract_strided_slice %80 {offsets = [38, 256], sizes = [16, 128], strides = [1, 1]} : vector<72x384xf32> to vector<16x128xf32>
    %95 = arith.addf %93, %94 : vector<16x128xf32>
    %96 = vector.extract_strided_slice %80 {offsets = [54, 0], sizes = [16, 128], strides = [1, 1]} : vector<72x384xf32> to vector<16x128xf32>
    %97 = vector.extract_strided_slice %80 {offsets = [55, 128], sizes = [16, 128], strides = [1, 1]} : vector<72x384xf32> to vector<16x128xf32>
    %98 = arith.addf %96, %97 : vector<16x128xf32>
    %99 = vector.extract_strided_slice %80 {offsets = [56, 256], sizes = [16, 128], strides = [1, 1]} : vector<72x384xf32> to vector<16x128xf32>
    %100 = arith.addf %98, %99 : vector<16x128xf32>
    %101 = tpu.concatenate %85, %90, %95, %100 in 0 : vector<16x128xf32>, vector<16x128xf32>, vector<16x128xf32>, vector<16x128xf32> -> vector<64x128xf32>
    %c0_44 = arith.constant 0 : index
    %c0_45 = arith.constant 0 : index
    %102 = vector.load %arg7[%c0_44, %c0_45] : memref<1x128xf32, #tpu.memory_space<vmem>>, vector<1x128xf32>
    %103 = vector.broadcast %102 : vector<1x128xf32> to vector<64x128xf32>
    %104 = arith.addf %101, %103 : vector<64x128xf32>
    %cst_46 = arith.constant dense<0.000000e+00> : vector<64x128xf32>
    %105 = tpu.matmul %104, %9, %cst_46 {dimension_numbers = #tpu.dot_dimension_numbers<[1], [0], [0], [1], [0, 0, 1, 1], [], []>} : vector<64x128xf32>, vector<128x128xf32>, vector<64x128xf32> -> vector<64x128xf32>
    %106 = arith.subf %104, %105 : vector<64x128xf32>
    %107 = arith.mulf %106, %106 : vector<64x128xf32>
    %cst_47 = arith.constant dense<0.000000e+00> : vector<64x128xf32>
    %108 = tpu.matmul %107, %9, %cst_47 {dimension_numbers = #tpu.dot_dimension_numbers<[1], [0], [0], [1], [0, 0, 1, 1], [], []>} : vector<64x128xf32>, vector<128x128xf32>, vector<64x128xf32> -> vector<64x128xf32>
    %cst_48 = arith.constant 9.99999974E-6 : f32
    %109 = vector.broadcast %cst_48 : f32 to vector<64x128xf32>
    %110 = arith.addf %108, %109 : vector<64x128xf32>
    %111 = math.rsqrt %110 : vector<64x128xf32>
    %112 = arith.mulf %106, %111 : vector<64x128xf32>
    %c0_49 = arith.constant 0 : index
    %c0_50 = arith.constant 0 : index
    %113 = vector.load %arg8[%c0_49, %c0_50] : memref<1x128xf32, #tpu.memory_space<vmem>>, vector<1x128xf32>
    %114 = vector.broadcast %113 : vector<1x128xf32> to vector<64x128xf32>
    %115 = arith.mulf %112, %114 : vector<64x128xf32>
    %c0_51 = arith.constant 0 : index
    %c0_52 = arith.constant 0 : index
    %116 = vector.load %arg9[%c0_51, %c0_52] : memref<1x128xf32, #tpu.memory_space<vmem>>, vector<1x128xf32>
    %117 = vector.broadcast %116 : vector<1x128xf32> to vector<64x128xf32>
    %118 = arith.addf %115, %117 : vector<64x128xf32>
    %119 = arith.addf %118, %10 : vector<64x128xf32>
    %cst_53 = arith.constant 0.000000e+00 : f32
    %120 = vector.broadcast %cst_53 : f32 to vector<64x128xf32>
    %121 = arith.maximumf %119, %120 : vector<64x128xf32>
    %c0_54 = arith.constant 0 : index
    %c0_55 = arith.constant 0 : index
    %122 = vector.load %arg11[%c0_54, %c0_55] : memref<64x128xf32, #tpu.memory_space<vmem>>, vector<64x128xf32>
    tpu.vector_store %arg11[%c0_54, %c0_55], %121 {strides = array<i32>} : memref<64x128xf32, #tpu.memory_space<vmem>>, vector<64x128xf32>,
    return
  }
  func.func @transform_0(%arg0: i32) -> (i32, i32) {
    %c0_i32 = arith.constant 0 : i32
    %c0_i32_0 = arith.constant 0 : i32
    return %arg0, %c0_i32 : i32, i32
  }
  func.func @transform_1(%arg0: i32) -> (i32, i32) {
    %c0_i32 = arith.constant 0 : i32
    %c0_i32_0 = arith.constant 0 : i32
    %c0_i32_1 = arith.constant 0 : i32
    return %c0_i32, %c0_i32_0 : i32, i32
  }
  func.func @transform_2(%arg0: i32) -> (i32, i32) {
    %c0_i32 = arith.constant 0 : i32
    %c0_i32_0 = arith.constant 0 : i32
    %c0_i32_1 = arith.constant 0 : i32
    return %c0_i32, %c0_i32_0 : i32, i32
  }
  func.func @transform_3(%arg0: i32) -> (i32, i32) {
    %c0_i32 = arith.constant 0 : i32
    %c0_i32_0 = arith.constant 0 : i32
    %c0_i32_1 = arith.constant 0 : i32
    return %c0_i32, %c0_i32_0 : i32, i32
  }
  func.func @transform_4(%arg0: i32) -> (i32, i32) {
    %c0_i32 = arith.constant 0 : i32
    %c0_i32_0 = arith.constant 0 : i32
    %c0_i32_1 = arith.constant 0 : i32
    return %c0_i32, %c0_i32_0 : i32, i32
  }
  func.func @transform_5(%arg0: i32) -> (i32, i32) {
    %c0_i32 = arith.constant 0 : i32
    %c0_i32_0 = arith.constant 0 : i32
    %c0_i32_1 = arith.constant 0 : i32
    return %c0_i32, %c0_i32_0 : i32, i32
  }
  func.func @transform_6(%arg0: i32) -> (i32, i32) {
    %c0_i32 = arith.constant 0 : i32
    %c0_i32_0 = arith.constant 0 : i32
    %c0_i32_1 = arith.constant 0 : i32
    return %c0_i32, %c0_i32_0 : i32, i32
  }
  func.func @transform_7(%arg0: i32) -> (i32, i32) {
    %c0_i32 = arith.constant 0 : i32
    %c0_i32_0 = arith.constant 0 : i32
    %c0_i32_1 = arith.constant 0 : i32
    return %c0_i32, %c0_i32_0 : i32, i32
  }
  func.func @transform_8(%arg0: i32) -> (i32, i32) {
    %c0_i32 = arith.constant 0 : i32
    %c0_i32_0 = arith.constant 0 : i32
    %c0_i32_1 = arith.constant 0 : i32
    return %c0_i32, %c0_i32_0 : i32, i32
  }
  func.func @transform_9(%arg0: i32) -> (i32, i32) {
    %c0_i32 = arith.constant 0 : i32
    %c0_i32_0 = arith.constant 0 : i32
    %c0_i32_1 = arith.constant 0 : i32
    return %c0_i32, %c0_i32_0 : i32, i32
  }
  func.func @transform_10(%arg0: i32) -> (i32, i32) {
    %c0_i32 = arith.constant 0 : i32
    %c0_i32_0 = arith.constant 0 : i32
    return %arg0, %c0_i32 : i32, i32
  }
}

</mosaic_0001>

<bundles_post_ra>
// kernel: tpu_custom_call.1
= control target key start
LH: loop header
LB: loop body
LE: loop exit
PB: predicated region body
PF: predicated region fallthrough
CT: control target
= control target key end

     0   :  { %s4335_s0 = inlined_call_operand.hbm [shape: f32[128,128], index: 0, kind: input, shape index: {}]   ;;  %s4336_s1 = inlined_call_operand.hbm [shape: bf16[128,384], index: 1, kind: input, shape index: {}]   ;;  %s4337_s2 = inlined_call_operand.vmem [shape: f32[1,128], index: 2, kind: input, shape index: {}]   ;;  %s4338_s3 = inlined_call_operand.vmem [shape: f32[1,128], index: 3, kind: input, shape index: {}]   ;;  %s4339_s4 = inlined_call_operand.vmem [shape: f32[1,128], index: 4, kind: input, shape index: {}]   ;;  %s4340_s5 = inlined_call_operand.hbm [shape: bf16[128,384], index: 5, kind: input, shape index: {}]   ;;  %s4341_s6 = inlined_call_operand.vmem [shape: f32[1,128], index: 6, kind: input, shape index: {}]   ;;  %s4342_s7 = inlined_call_operand.vmem [shape: f32[1,128], index: 7, kind: input, shape index: {}]   ;;  %s4343_s8 = inlined_call_operand.vmem [shape: f32[1,128], index: 8, kind: input, shape index: {}]   ;;  %s4344_s9 = inlined_call_operand.hbm [shape: f32[128,128], index: 9, kind: input, shape index: {}]   ;;  %s4345_s10 = inlined_call_operand.hbm [shape: f32[128,128], index: 10, kind: output, shape index: {}]  }
   0x1   :  { %4360 = sst [smem:[#allocation18_spill]] %s4343_s8 }
   0x2   :  { %4361 = sst [smem:[#allocation19_spill]] %s4345_s10 }
   0x3   :  { %15 = vsyncpa [#allocation4], 0 }
   0x4   :  { %17 = vsyncpa [#allocation4 + $0x1], 0 }
   0x5   :  { %18 = vsyncpa [#allocation7], 0 }
   0x6   :  { %19 = vsyncpa [#allocation10], 0 }
   0x7   :  { %20 = vsyncpa [#allocation5], 0 }
   0x8   :  { %22 = vsyncpa [#allocation5 + $0x1], 0  ;;  %s3539_s13 = smov 0   ;;  %s3541_s14 = smov 0  }
   0x9   :  { %s3543_s15 = smov 0   ;;  %s3545_s16 = smov 0  }
   0xa LB: > { %4362 = sst [smem:[#allocation16_spill]] %s3456_s13  ;;  %s3560_s17 = sadd.s32 4294967295, %s3468_s16   ;;  %s3468_s16 = sphi %s3545_s16, %s4465_s16   ;;  %s3464_s15 = sphi %s3543_s15, %s4464_s15   ;;  %s3460_s14 = sphi %s3541_s14, %s4463_s14   ;;  %s3456_s13 = sphi %s3539_s13, %s4462_s13  }
   0xb   : > { %s2464_s18 = sadd.s32 4294967294, %s3468_s16   ;;  %p48_p0 = scmp.ne.s32.totalorder %s3460_s14, %s3456_s13 }
   0xc   : > { %p4346_p1 = scmp.eq.s32.totalorder %s3560_s17, 0  ;;  %p267_p3 = scmp.eq.s32.totalorder %s2464_s18, 1 }
   0xd   : > { %p2465_p5 = scmp.ge.s32.totalorder %s3468_s16, 1  ;;  %p274_p7 = scmp.lt.s32.totalorder %s3468_s16, 3 }
   0xe   : > { %p3569_p4 = por %p4346_p1, %p48_p0  ;;  %p3574_p6 = por %p267_p3, %p48_p0 }
   0xf   : > { %p3579_p8 = pnand %p2465_p5, %p274_p7  ;;  %s3470_s22 = smov [#allocation6]  }
  0x10   : > { %s4363_s19 = scalar_select %p3569_p4, 1, 0 }
  0x11   : > { %s4364_s20 = scalar_select %p3574_p6, 1, 0 }
  0x12   : > { %s4366_s21 = scalar_select %p3579_p8, 1, 0 }
  0x13   : > { %4365 = sst [smem:[#allocation17_spill]] %s4364_s20  ;;  %s286_s23 = sshll.u32 %s3470_s22, 4  ;;  %s3583_s23 = int_to_ptr.vmem [resolvable:$true] %s286_s23 }
  0x14   : > { %p3096_p9 = pneg %p3579_p8  ;;  %s3471_s25 = smov [#allocation8]  }
  0x15   : > { %s308_s26 = sshll.u32 %s3471_s25, 4  ;;  %s3472_s27 = smov [#allocation9]   ;;  %s3594_s26 = int_to_ptr.vmem [resolvable:$true] %s308_s26 }
  0x16   : > { %p3590_p11 = pnand %p3096_p9, %p4346_p1  ;;  %s3596_s28 = sshll.u32 %s3472_s27, 4  ;;  %s331_s28 = int_to_ptr.vmem [resolvable:$true] %s3596_s28 }
  0x17   : > { %s3280_s11 = scalar_lea.hbm %s4336_s1, 3072 }
  0x18   : > { %p3281_p12 = scmp.ne.s32.totalorder %s4336_s1, %s3280_s11  ;;  %p3606_p13 = pneg %p3590_p11 }
  0x19   : > { %p3287_p5 = scmp.lt.u32.totalorder %s3280_s11, %s4336_s1 }
  0x1a   : > { %p3283_p0 = pnand %p3606_p13, %p3281_p12 }
  0x1c   : > { %p3284_p3 = pneg %p3283_p0 }
  0x1e   : > { %p3289_p7 = pnand %p3287_p5, %p3284_p3 }
  0x20   : > { %3292 = shalt.err (!%p3289_p7)
}
  0x21   : > { %s3293_s29 = scalar_lea.vmem %s3583_s23, 3072  ;;  %p3301_p2 = scmp.lt.s32.totalorder %s3583_s23, %s3583_s23 }
  0x22   : > { %p3294_p9 = scmp.ne.s32.totalorder %s3583_s23, %s3293_s29  ;;  %p3302_p6 = scmp.lt.s32.totalorder %s3293_s29, %s3293_s29 }
  0x24   : > { %p3296_p10 = pnand %p3294_p9, %p3606_p13  ;;  %p3303_p12 = por %p3302_p6, %p3301_p2 }
  0x26   : > { %p3297_p1 = pneg %p3296_p10 }
  0x28   : > { %p3304_p0 = pnand %p3303_p12, %p3297_p1 }
  0x2a   : > { %3307 = shalt.err (!%p3304_p0)
}
  0x2b   : > { %s3473_s30 = smov 192   ;;  %s3474_s11 = smov 12  }
  0x2c   : > { %3099 = dma.hbm_to_vmem [thread:$0]  (!%p3590_p11), %s4336_s1, 3072, %s3583_s23, [#allocation7], %s3473_s30, %s3473_s30, %s3474_s11  }
  0x2d   : > { %s3308_s20 = scalar_lea.hbm %s4340_s5, 3072 }
  0x2e   : > { %p3309_p2 = scmp.ne.s32.totalorder %s4340_s5, %s3308_s20  ;;  %p3315_p10 = scmp.lt.u32.totalorder %s3308_s20, %s4340_s5 }
  0x30   : > { %p3311_p1 = pnand %p3309_p2, %p3606_p13 }
  0x32   : > { %p3312_p6 = pneg %p3311_p1 }
  0x34   : > { %p3317_p3 = pnand %p3315_p10, %p3312_p6 }
  0x36   : > { %3320 = shalt.err (!%p3317_p3)
}
  0x37   : > { %s3321_s23 = scalar_lea.vmem %s3594_s26, 3072  ;;  %p3329_p12 = scmp.lt.s32.totalorder %s3594_s26, %s3594_s26 }
  0x38   : > { %p3322_p5 = scmp.ne.s32.totalorder %s3594_s26, %s3321_s23  ;;  %p3330_p0 = scmp.lt.s32.totalorder %s3321_s23, %s3321_s23 }
  0x3a   : > { %p3324_p7 = pnand %p3322_p5, %p3606_p13  ;;  %p3331_p2 = por %p3330_p0, %p3329_p12 }
  0x3c   : > { %p3325_p9 = pneg %p3324_p7 }
  0x3e   : > { %p3332_p1 = pnand %p3331_p2, %p3325_p9 }
  0x40   : > { %3335 = shalt.err (!%p3332_p1)
}
  0x41   : > { %3102 = dma.hbm_to_vmem [thread:$0]  (!%p3590_p11), %s4340_s5, 3072, %s3594_s26, [#allocation7], %s3473_s30, %s3473_s30, %s3474_s11  }
  0x42   : > { %s3336_s12 = scalar_lea.hbm %s4344_s9, 2048 }
  0x43   : > { %p3337_p6 = scmp.ne.s32.totalorder %s4344_s9, %s3336_s12  ;;  %p3343_p5 = scmp.lt.u32.totalorder %s3336_s12, %s4344_s9 }
  0x45   : > { %p3339_p10 = pnand %p3337_p6, %p3606_p13 }
  0x47   : > { %p3340_p3 = pneg %p3339_p10 }
  0x49   : > { %p3345_p7 = pnand %p3343_p5, %p3340_p3 }
  0x4b   : > { %3348 = shalt.err (!%p3345_p7)
}
  0x4c   : > { %s3349_s23 = scalar_lea.vmem %s331_s28, 2048  ;;  %p3357_p2 = scmp.lt.s32.totalorder %s331_s28, %s331_s28 }
  0x4d   : > { %p3350_p9 = scmp.ne.s32.totalorder %s331_s28, %s3349_s23  ;;  %p3358_p1 = scmp.lt.s32.totalorder %s3349_s23, %s3349_s23 }
  0x4f   : > { %p3352_p12 = pnand %p3350_p9, %p3606_p13  ;;  %p3359_p4 = por %p3358_p1, %p3357_p2 }
  0x51   : > { %p3353_p0 = pneg %p3352_p12 }
  0x53   : > { %p3360_p8 = pnand %p3359_p4, %p3353_p0 }
  0x55   : > { %3363 = shalt.err (!%p3360_p8)
}
  0x56   : > { %s3475_s26 = smov 128   ;;  %s3476_s22 = smov 8  }
  0x57   : > { %3105 = dma.hbm_to_vmem [thread:$0]  (!%p3590_p11), %s4344_s9, 2048, %s331_s28, [#allocation10], %s3475_s26, %s3475_s26, %s3476_s22  }
  0x58   : > { %s3673_s8 = sadd.s32 1, %s3468_s16   ;;  %s35_s13 = sadd.s32 1, %s3464_s15 }
  0x59   : > { %s32_s10 = ssub.s32 %s3468_s16, %s3673_s8  ;;  %p42_p8 = scmp.ne.s32.totalorder %s3464_s15, %s3460_s14 }
  0x5a   : > { %p33_p4 = scmp.eq.s32.totalorder %s32_s10, 0  ;;  %p43_p13 = scmp.eq.s32.totalorder %s3468_s16, 0 }
  0x5b   : > { %p3117_p6 = scmp.lt.s32.totalorder %s3468_s16, 2  ;;  %p4369_p3 = scmp.eq.s32.totalorder %s3560_s17, 1 }
  0x5c   : > { %s3683_s20 = scalar_select %p33_p4, %s3464_s15, %s35_s13  }
  0x5d   : > { %p44_p10 = por %p43_p13, %p42_p8  ;;  %p3687_p5 = por %p4369_p3, %p42_p8 }
  0x5e   : > { %s344_s12 = sand.u32 1, %s3464_s15   ;;  %s2564_s18 = sshll.u32 %s3468_s16, 10 }
  0x5f   : > { %s2470_s28 = sshll.u32 %s344_s12, 6  ;;  %s3696_s29 = scalar_lea.hbm %s4335_s0, %s2564_s18 }
  0x60   : > { %s348_s23 = scalar_lea.vmem [#allocation3], %s2470_s28  ;;  %p3698_p11 = pnand %p3117_p6, %p44_p10 }
  0x61   : > { %s355_s30 = sshll.u32 %s348_s23, 4  ;;  %s3704_s10 = scalar_lea.sflag [#allocation4], %s344_s12  ;;  %s3702_s30 = int_to_ptr.vmem [resolvable:$true] %s355_s30 }
  0x62   : > { %s3364_s13 = scalar_lea.hbm %s3696_s29, 1024  ;;  %p3366_p9 = pneg %p3698_p11 }
  0x63   : > { %p3365_p7 = scmp.ne.s32.totalorder %s3696_s29, %s3364_s13  ;;  %s3369_s25 = scalar_lea.hbm %s4335_s0, 2048 }
  0x64   : > { %p3370_p2 = scmp.lt.u32.totalorder %s3696_s29, %s4335_s0  ;;  %p3371_p1 = scmp.lt.u32.totalorder %s3369_s25, %s3364_s13 }
  0x65   : > { %p3367_p12 = pnand %p3366_p9, %p3365_p7  ;;  %p3373_p8 = scmp.lt.u32.totalorder %s3364_s13, %s3696_s29 }
  0x66   : > { %p3372_p4 = por %p3371_p1, %p3370_p2 }
  0x67   : > { %p3368_p0 = pneg %p3367_p12 }
  0x68   : > { %p3374_p13 = por %p3373_p8, %p3372_p4 }
  0x6a   : > { %p3375_p6 = pnand %p3374_p13, %p3368_p0 }
  0x6c   : > { %3378 = shalt.err (!%p3375_p6)
}
  0x6d   : > { %s3379_s12 = scalar_lea.vmem %s3702_s30, 1024  ;;  %s3477_s18 = smov [#allocation3]  }
  0x6e   : > { %p3380_p10 = scmp.ne.s32.totalorder %s3702_s30, %s3379_s12  ;;  %s3384_s28 = sshll.u32 %s3477_s18, 4  ;;  %s3385_s28 = int_to_ptr.vmem [resolvable:$false] %s3384_s28 }
  0x6f   : > { %s3386_s27 = scalar_lea.vmem %s3385_s28, 2048  ;;  %p3387_p12 = scmp.lt.s32.totalorder %s3702_s30, %s3385_s28 }
  0x70   : > { %p3382_p3 = pnand %p3380_p10, %p3366_p9  ;;  %p3388_p2 = scmp.lt.s32.totalorder %s3386_s27, %s3379_s12 }
  0x72   : > { %p3383_p7 = pneg %p3382_p3  ;;  %p3389_p1 = por %p3388_p2, %p3387_p12 }
  0x74   : > { %p3390_p4 = pnand %p3389_p1, %p3383_p7 }
  0x76   : > { %3393 = shalt.err (!%p3390_p4)
}
  0x77   : > { %3109 = dma.hbm_to_vmem [thread:$0]  (!%p3698_p11), %s3696_s29, 1024, %s3702_s30, %s3704_s10, %s3475_s26, %s3475_s26, %s3476_s22  }
  0x78   : > { %p4372_p9 = scmp.ne.s32.totalorder %s4366_s21, 0 }
  0x79   : > { %s3738_s13 = sand.u32 (!%p4372_p9), 1, %s3460_s14   ;;  %p4373_p0 = scmp.ne.s32.totalorder (!%p4372_p9), %s4363_s19, 0 }
  0x7a   : > { %367 = sbr.rel (%p4372_p9) target bundleno = 1603 (0x643), region = 60  ;;  %s2474_s25 = sshll.u32 (!%p4372_p9), %s3738_s13, 6 }
  0x7b   : > { %s370_s23 = scalar_lea.sflag (!%p4372_p9), [#allocation4], %s3738_s13  ;;  %s3744_s11 = scalar_lea.vmem (!%p4372_p9), [#allocation3], %s2474_s25 }
  0x81   : > { %3439 = dma.done.wait (%p4373_p0), %s370_s23, 1024  }
  0x82   : > { %3441 = vsyncadd (%p4373_p0), %s370_s23, 4294966272  ;;  %p4374_p11 = scmp.eq.s32.totalorder %s3560_s17, 0 }
  0x84   : > { %3443 = dma.done.wait (%p4374_p11), [#allocation7], 6144   ;;  %p4375_p8 = pmov %p4374_p11 }
  0x86   : > { %3445 = vsyncadd (%p4375_p8), [#allocation7], 4294961152  ;;  %p4376_p13 = pmov %p4375_p8 }
  0x87   : > { %p4377_p6 = pmov %p4375_p8 }
  0x88   : > { %3447 = dma.done.wait (%p4376_p13), [#allocation10], 2048  }
  0x89   : > { %3449 = vsyncadd (%p4377_p6), [#allocation10], 4294965248  ;;  %v3478_v0 = vmov 0.0   ;;  %vm4352_vm0 = vmmov 0   ;;  %v3480_v1 = vmov 0   ;;  %vm425_vm1 = vcmask 1040384  }
  0x8a   : > { %2704 = vmatprep.subr.bf16.mxu1 %v3478_v0  ;;  %2720 = vmatprep.mubr.msk.bf16.mxu1 %vm4352_vm0, %v3478_v0  ;;  %v3166_v2 = vld [vmem:[#allocation6 + $0x4] ss:$12 sps:$4 sm:$0xff]   ;;  %v3168_v3 = vld [vmem:[#allocation6 + $0x8] ss:$12 sps:$4 sm:$0xff]   ;;  %v3169_v4 = vld [vmem:[#allocation6] ss:$12 sps:$4 sm:$0xff]  }
  0x8b   : > { %879 = vmatprep.mubr.bf16.mxu0 %v3480_v1  ;;  %847 = vmatprep.subr.bf16.mxu0 %v3166_v2  ;;  %v3170_v5 = vld [vmem:[#allocation6 + $0x1c] ss:$12 sps:$4 sm:$0xff]   ;;  %v3172_v6 = vld [vmem:[#allocation6 + $0x20] ss:$12 sps:$4 sm:$0xff]   ;;  %v3173_v7 = vld [vmem:[#allocation6 + $0x18] ss:$12 sps:$4 sm:$0xff]  }
  0x8c   : > { %2705 = vmatpush3.bf16.msra.mxu1 %v3168_v3  ;;  %848 = vmatpush1.bf16.msra.mxu0 %v3169_v4  ;;  %v3174_v8 = vld [vmem:[#allocation6 + $0x34] ss:$12 sps:$4 sm:$0xff]   ;;  %vm426_vm2 = vsmask.f32 256  ;;  %v3176_v9 = vld [vmem:[#allocation6 + $0x38] ss:$12 sps:$4 sm:$0xff]  }
  0x8d   : > { %2706 = vmatprep.subr.bf16.mxu1 %v3478_v0  ;;  %849 = vmatprep.subr.bf16.mxu0 %v3170_v5  ;;  %vm431_vm3 = vsmask.f32 7938  ;;  %v3177_v10 = vld [vmem:[#allocation6 + $0x30] ss:$12 sps:$4 sm:$0xff]   ;;  %v3178_v11 = vld [vmem:[#allocation6 + $0x4c] ss:$12 sps:$4 sm:$0xff]   ;;  %vm3766_vm6 = vmand %vm425_vm1, %vm426_vm2 }
  0x8e   : > { %vm499_vm4 = vsmask.f32 4368  ;;  %vm4354_vm5 = vsmask.f32 1280  ;;  %v3180_v12 = vld [vmem:[#allocation6 + $0x50] ss:$12 sps:$4 sm:$0xff]   ;;  %vm3773_vm10 = vmand %vm425_vm1, %vm431_vm3 }
  0x8f   : > { %vm436_vm7 = vcmask 1041409   ;;  %vm442_vm8 = vsmask.f32 7942  ;;  %v3181_v14 = vld [vmem:[#allocation6 + $0x48] ss:$12 sps:$4 sm:$0xff]   ;;  %vm4355_vm9 = vcmask 1043456  }
  0x90   : > { %2707 = vmatpush3.bf16.msra.mxu1 %v3172_v6  ;;  %850 = vmatpush1.bf16.msra.mxu0 %v3173_v7  ;;  %v3182_v15 = vld [vmem:[#allocation6 + $0x64] ss:$12 sps:$4 sm:$0xff]   ;;  %vm536_vm11 = vsmask.f32 5392  ;;  %vm3779_vm12 = vmand %vm436_vm7, %vm4354_vm5  ;;  %vm447_vm14 = vcmask 1042434   ;;  %v486_v28 = vld [vmem:[%s3744_s11 + $0x8] sm:$0xff] }
  0x91   : > { %2708 = vmatprep.subr.bf16.mxu1 %v3478_v0  ;;  %851 = vmatprep.subr.bf16.mxu0 %v3174_v8  ;;  %vm448_vm15 = vsmask.f32 2304  ;;  %v3184_v18 = vld [vmem:[#allocation6 + $0x68] ss:$12 sps:$4 sm:$0xff]   ;;  %v3185_v19 = vld [vmem:[#allocation6 + $0x60] ss:$12 sps:$4 sm:$0xff]   ;;  %vm3786_vm5 = vmor %vm426_vm2, %vm499_vm4  ;;  %v2566_v31 = vpack.c.bf16 %v486_v28, %v486_v28 }
  0x92   : > { %v3186_v20 = vld [vmem:[#allocation6 + $0x7c] ss:$12 sps:$4 sm:$0xff]   ;;  %vm577_vm13 = vsmask.f32 6416  ;;  %v3188_v22 = vld [vmem:[#allocation6 + $0x80] ss:$12 sps:$4 sm:$0xff]   ;;  %vm3799_vm2 = vmand %vm436_vm7, %vm442_vm8 }
  0x93   : > { %v3189_v23 = vld [vmem:[#allocation6 + $0x78] ss:$12 sps:$4 sm:$0xff]   ;;  %v428_v24 = vld [vmem:[#allocation2] sm:$0x1]  ;;  %vm4356_vm0 = vsmask.f32 3328  ;;  %vm3809_vm7 = vmand %vm4355_vm9, %vm431_vm3 }
  0x94   : > { %2709 = vmatpush3.bf16.msra.mxu1 %v3176_v9  ;;  %852 = vmatpush1.bf16.msra.mxu0 %v3177_v10  ;;  %v3190_v25 = vld [vmem:[#allocation6 + $0x94] ss:$12 sps:$4 sm:$0xff]   ;;  %v429_v26 = vsel %vm3766_vm6, 0, %v428_v24  ;;  %v433_v29 = vld [vmem:[#allocation2 + $0x8] sm:$0x1]  ;;  %v488_v38 = vld [vmem:[%s3744_s11 + $0x18] sm:$0xff] }
  0x95   : > { %2710 = vmatprep.subr.bf16.mxu1 %v3478_v0  ;;  %853 = vmatprep.subr.bf16.mxu0 %v3178_v11  ;;  %v485_v27 = vld [vmem:[%s3744_s11] sm:$0xff]  ;;  %430 = vst [vmem:[#allocation2] sm:$0x1] %v429_v26  ;;  %v434_v32 = vsel %vm3773_vm10, 0, %v433_v29  ;;  %v487_v35 = vld [vmem:[%s3744_s11 + $0x10] sm:$0xff]  ;;  %v510_v44 = vshrl.u32 %v2566_v31, 16  ;;  %v2568_v47 = vpack.c.bf16 %v488_v38, %v488_v38  ;;  %vm3826_vm3 = vmand %vm447_vm14, %vm448_vm15 }
  0x96   : > { %v2565_v30 = vpack.c.bf16 %v485_v27, %v485_v27  ;;  %v439_v33 = vld [vmem:[#allocation2 + $0x8] sm:$0x2]  ;;  %435 = vst [vmem:[#allocation2 + $0x8] sm:$0x1] %v434_v32  ;;  %v2567_v39 = vpack.c.bf16 %v487_v35, %v487_v35  ;;  %v444_v40 = vld [vmem:[#allocation2 + $0x10] sm:$0x2] }
  0x97   : > { %v3192_v36 = vld [vmem:[#allocation6 + $0x98] ss:$12 sps:$4 sm:$0xff]   ;;  %v440_v37 = vsel %vm3779_vm12, 0, %v439_v33  ;;  %v3193_v41 = vld [vmem:[#allocation6 + $0x90] ss:$12 sps:$4 sm:$0xff]   ;;  %v513_v45 = vshll.u32 %v2566_v31, 16 }
  0x98   : > { %2711 = vmatpush3.bf16.msra.mxu1 %v3180_v12  ;;  %854 = vmatpush1.bf16.msra.mxu0 %v3181_v14  ;;  %v502_v42 = vshrl.u32 %v2565_v30, 16  ;;  %v505_v43 = vshll.u32 %v2565_v30, 16  ;;  %441 = vst [vmem:[#allocation2 + $0x8] sm:$0x2] %v440_v37  ;;  %vm4390_vm10 = vsmask.f32 1280 }
  0x99   : > { %2712 = vmatprep.subr.bf16.mxu1 %v3478_v0  ;;  %855 = vmatprep.subr.bf16.mxu0 %v3182_v15  ;;  %vm3815_vm12 = vmor %vm4390_vm10, %vm536_vm11  ;;  %v539_v49 = vshrl.u32 %v2567_v39, 16  ;;  %v542_v50 = vshll.u32 %v2567_v39, 16  ;;  %v445_v51 = vsel %vm3799_vm2, 0, %v444_v40  ;;  %v489_v52 = vld [vmem:[%s3744_s11 + $0x20] sm:$0xff]  ;;  %v490_v53 = vld [vmem:[%s3744_s11 + $0x28] sm:$0xff]  ;;  %v512_v56 = vrot.slane %v510_v44, 7 }
  0x9a   : > { %v3194_v54 = vld [vmem:[#allocation6 + $0xac] ss:$12 sps:$4 sm:$0xff]   ;;  %v504_v55 = vrot.slane %v502_v42, 7  ;;  %446 = vst [vmem:[#allocation2 + $0x10] sm:$0x2] %v445_v51  ;;  %v2569_v59 = vpack.c.bf16 %v489_v52, %v489_v52  ;;  %v3830_v60 = vpack.c.bf16 %v490_v53, %v490_v53  ;;  %v548_v2 = vshrl.u32 %v2568_v47, 16 }
  0x9b   : > { %v450_v58 = vld [vmem:[#allocation2 + $0x10] sm:$0x4]  ;;  %v3196_v61 = vld [vmem:[#allocation6 + $0xb0] ss:$12 sps:$4 sm:$0xff]   ;;  %v541_v62 = vrot.slane %v539_v49, 6  ;;  %v544_v63 = vrot.slane %v542_v50, 7  ;;  %v515_v8 = vor.u32 %v513_v45, %v512_v56 }
  0x9c   : > { %2713 = vmatpush3.bf16.msra.mxu1 %v3184_v18  ;;  %856 = vmatpush1.bf16.msra.mxu0 %v3185_v19  ;;  %v551_v3 = vshll.u32 %v2568_v47, 16  ;;  %vm4395_vm2 = vcmask 1043457   ;;  %v3197_v5 = vld [vmem:[#allocation6 + $0xa8] ss:$12 sps:$4 sm:$0xff]   ;;  %v507_v6 = vor.u32 %v505_v43, %v504_v55  ;;  %v508_v7 = vrot.slane %v504_v55, 4  ;;  %v492_v28 = vld [vmem:[%s3744_s11 + $0x38] sm:$0xff] }
  0x9d   : > { %2714 = vmatprep.subr.bf16.mxu1 %v3478_v0  ;;  %857 = vmatprep.subr.bf16.mxu0 %v3186_v20  ;;  %vm3834_vm10 = vmand %vm4395_vm2, %vm442_vm8  ;;  %v517_v9 = vrot.slane %v512_v56, 4  ;;  %vm4398_vm9 = vsmask.f32 1280  ;;  %vm4399_vm11 = vcmask 1041408   ;;  %v455_v11 = vld [vmem:[#allocation2 + $0x18] sm:$0x4]  ;;  %v545_v14 = vor.u32 %v544_v63, %v541_v62 }
  0x9e   : > { %vm3840_vm4 = vmand %vm4399_vm11, %vm4398_vm9  ;;  %v523_v12 = vld [vmem:[#allocation2] sm:$0xf]  ;;  %v550_v15 = vrot.slane %v548_v2, 6  ;;  %v553_v16 = vrot.slane %v551_v3, 7  ;;  %v451_v17 = vsel %vm3826_vm3, 0, %v450_v58  ;;  %v491_v20 = vld [vmem:[%s3744_s11 + $0x30] sm:$0xff]  ;;  %v2572_v58 = vpack.c.bf16 %v492_v28, %v492_v28 }
  0x9f   : > { %vm4402_vm8 = vsmask.f32 7946  ;;  %v461_v19 = vld [vmem:[#allocation2 + $0x18] sm:$0x8]  ;;  %v527_v24 = vld [vmem:[#allocation2 + $0x8] sm:$0x1]  ;;  %vm3860_vm9 = vmor %vm448_vm15, %vm577_vm13 }
  0xa0   : > { %2715 = vmatpush3.bf16.msra.mxu1 %v3188_v22  ;;  %858 = vmatpush1.bf16.msra.mxu0 %v3189_v23  ;;  %vm3848_vm2 = vmand %vm447_vm14, %vm4402_vm8  ;;  %v516_v22 = vsel %vm3786_vm5, %v508_v7, %v515_v8  ;;  %v524_v23 = vsel %vm3809_vm7, %v507_v6, %v523_v12  ;;  %452 = vst [vmem:[#allocation2 + $0x10] sm:$0x4] %v451_v17  ;;  %v580_v26 = vshrl.u32 %v2569_v59, 16  ;;  %v583_v27 = vshll.u32 %v2569_v59, 16  ;;  %v562_v32 = vld [vmem:[#allocation2 + $0x8] sm:$0xe] }
  0xa1   : > { %2716 = vmatprep.subr.bf16.mxu1 %v3478_v0  ;;  %859 = vmatprep.subr.bf16.mxu0 %v3190_v25  ;;  %525 = vst [vmem:[#allocation2] sm:$0xf] %v524_v23  ;;  %526 = vst [vmem:[#allocation2 + $0x4] sm:$0xf] %v516_v22  ;;  %v528_v29 = vsel %vm3766_vm6, %v517_v9, %v527_v24  ;;  %v546_v30 = vrot.slane %v545_v14, 4  ;;  %v554_v31 = vor.u32 %v553_v16, %v550_v15  ;;  %vm4407_vm14 = vcmask 1043459  }
  0xa2   : > { %v589_v33 = vshrl.u32 %v3830_v60, 16  ;;  %vm3870_vm13 = vmand %vm4407_vm14, %vm4356_vm0  ;;  %v466_v35 = vld [vmem:[#allocation2 + $0x20] sm:$0x8]  ;;  %529 = vst [vmem:[#allocation2 + $0x8] sm:$0x1] %v528_v29  ;;  %v582_v37 = vrot.slane %v580_v26, 5 }
  0xa3   : > { %v585_v38 = vrot.slane %v583_v27, 6  ;;  %v592_v39 = vshll.u32 %v3830_v60, 16  ;;  %vm4410_vm3 = vsmask.f32 7950  ;;  %vm4411_vm11 = vmmov %vm4407_vm14  ;;  %v470_v42 = vld [vmem:[#allocation9 + $0x8] sm:$0xff]  ;;  %v555_v43 = vsel %vm3815_vm12, %v546_v30, %v554_v31  ;;  %v471_v55 = vld [vmem:[#allocation9 + $0x10] sm:$0xff] }
  0xa4   : > { %2717 = vmatpush3.bf16.msra.mxu1 %v3192_v36  ;;  %860 = vmatpush1.bf16.msra.mxu0 %v3193_v41  ;;  %v563_v36 = vsel %vm3834_vm10, %v545_v14, %v562_v32  ;;  %vm3879_vm8 = vmand %vm4411_vm11, %vm4410_vm3  ;;  %v469_v41 = vld [vmem:[#allocation9] sm:$0xff]  ;;  %v556_v44 = vrot.slane %v554_v31, 4  ;;  %v568_v45 = vld [vmem:[#allocation2 + $0x10] sm:$0x3]  ;;  %v591_v47 = vrot.slane %v589_v33, 5  ;;  %vm4415_vm0 = vcmask 1043458  }
  0xa5   : > { %2718 = vmatprep.subr.bf16.mxu1 %v3478_v0  ;;  %861 = vmatprep.subr.bf16.mxu0 %v3194_v54  ;;  %564 = vst [vmem:[#allocation2 + $0x8] sm:$0xe] %v563_v36  ;;  %vm4414_vm14 = vsmask.f32 7946  ;;  %v456_v50 = vsel %vm3848_vm2, 0, %v455_v11  ;;  %v586_v51 = vor.u32 %v585_v38, %v582_v37  ;;  %v594_v52 = vrot.slane %v592_v39, 6 }
  0xa6   : > { %vm3887_vm1 = vmand %vm4415_vm0, %vm4414_vm14  ;;  %565 = vst [vmem:[#allocation2 + $0xc] sm:$0xf] %v555_v43  ;;  %v462_v53 = vsel %vm3870_vm13, 0, %v461_v19  ;;  %v2571_v54 = vpack.c.bf16 %v491_v20, %v491_v20  ;;  %v472_v56 = vld [vmem:[#allocation9 + $0x18] sm:$0xff]  ;;  %v569_v57 = vsel %vm3840_vm4, %v556_v44, %v568_v45  ;;  %v467_v59 = vsel %vm3879_vm8, 0, %v466_v35  ;;  %v473_v15 = vld [vmem:[#allocation9 + $0x20] sm:$0xff] }
  0xa7   : > { %457 = vst [vmem:[#allocation2 + $0x18] sm:$0x4] %v456_v50  ;;  %463 = vst [vmem:[#allocation2 + $0x18] sm:$0x8] %v462_v53  ;;  %v3899_v60 = vpack.c.bf16 %v470_v42, %v469_v41  ;;  %v595_v62 = vor.u32 %v594_v52, %v591_v47  ;;  %v603_v3 = vld [vmem:[#allocation2 + $0x10] sm:$0xc]  ;;  %v3913_v14 = vpack.c.bf16 %v472_v56, %v471_v55 }
  0xa8   : > { %2719 = vmatpush3.bf16.msra.mxu1 %v3196_v61  ;;  %862 = vmatpush1.bf16.msra.mxu0 %v3197_v5  ;;  %570 = vst [vmem:[#allocation2 + $0x10] sm:$0x3] %v569_v57  ;;  %v587_v61 = vrot.slane %v586_v51, 4  ;;  %v621_v63 = vshll.u32 %v2571_v54, 16  ;;  %v624_v2 = vshrl.u32 %v2571_v54, 16  ;;  %vm4418_vm0 = vcmask 1042432  }
  0xa9   : > { %468 = vst [vmem:[#allocation2 + $0x20] sm:$0x8] %v467_v59  ;;  %vm3903_vm2 = vmand %vm4418_vm0, %vm448_vm15  ;;  %v630_v6 = vshll.u32 %v2572_v58, 16  ;;  %v634_v7 = vshrl.u32 %v2572_v58, 16  ;;  %2953 = vmatprep.subr.bf16.mxu0 %v3899_v60  ;;  %2985 = vmatprep.subr.bf16.mxu1 %v3899_v60  ;;  %v3198_v8 = vld [vmem:[#allocation2] sm:$0xff]   ;;  %v597_v11 = vrot.slane %v595_v62, 4  ;;  %v604_v12 = vsel %vm3887_vm1, %v586_v51, %v603_v3 }
  0xaa   : > { %v596_v9 = vsel %vm3860_vm9, %v587_v61, %v595_v62  ;;  %v474_v16 = vld [vmem:[#allocation9 + $0x28] sm:$0xff]  ;;  %605 = vst [vmem:[#allocation2 + $0x10] sm:$0xc] %v604_v12  ;;  %vm4421_vm15 = vsmask.f32 7440  ;;  %v4423_v17 = vmov 0 }
  0xab   : > { %606 = vst [vmem:[#allocation2 + $0x14] sm:$0xf] %v596_v9  ;;  %vm4422_vm13 = vsmask.f32 3328  ;;  %v623_v18 = vrot.slane %v621_v63, 5  ;;  %v626_v19 = vrot.slane %v624_v2, 4  ;;  %2721 = vmatmul.mubr.bf16.vlgmr.msra.gmra.mrb[0].mxu1 %v3198_v8  ;;  %880 = vmatmul.mubr.bf16.vlgmr.msra.gmra.mrb[0].mxu0 %v3198_v8  ;;  %v3937_v37 = vpack.c.bf16 %v474_v16, %v473_v15 }
  0xac   : > { %vm3917_vm3 = vmor %vm4422_vm13, %vm4421_vm15  ;;  %v632_v20 = vrot.slane %v630_v6, 5  ;;  %v636_v22 = vrot.slane %v634_v7, 4  ;;  %vm4425_vm11 = vmmov 0   ;;  %889 = vmatprep.mubr.bf16.mxu0 %v3480_v1  ;;  %vm4427_vm0 = vcmask 1043456   ;;  %2955 = vmatpush3.bf16.msra.mxu0 %v3899_v60  ;;  %v475_v31 = vld [vmem:[#allocation9 + $0x30] sm:$0xff]  ;;  %v476_v32 = vld [vmem:[#allocation9 + $0x38] sm:$0xff] }
  0xad   : > { %v4424_v17 = vsel %vm3917_vm3, 4294967295, %v4423_v17  ;;  %2724 = vmatprep.mubr.msk.bf16.mxu1 %vm4425_vm11, %v3478_v0  ;;  %v627_v24 = vor.u32 %v626_v19, %v623_v18  ;;  %vm4426_vm14 = vmmov %vm4422_vm13  ;;  %v3199_v28 = vld [vmem:[#allocation2 + $0x8] sm:$0xff]   ;;  %2987 = vmatpush3.bf16.msra.mxu1 %v3899_v60  ;;  %v3947_v41 = vpack.c.bf16 %v476_v32, %v475_v31  ;;  %v479_v51 = vld [vmem:[#allocation9 + $0x50] sm:$0xff]  ;;  %vm4359_vm13 = vcmask 1045504   ;;  %s4456_s19 = sld [smem:[#allocation18_spill]]  ;;  %s4252_s21 = scalar_lea.vmem [#allocation11], %s2474_s25 }
  0xae   : > { %v609_v23 = vld [vmem:[#allocation2 + $0x18] sm:$0x7]  ;;  %v637_v26 = vor.u32 %v636_v22, %v632_v20  ;;  %vm3926_vm15 = vmand %vm4427_vm0, %vm4426_vm14  ;;  %v642_v30 = vld [vmem:[#allocation2 + $0x18] sm:$0x8]  ;;  %2957 = vmatprep.subr.bf16.mxu0 %v3913_v14  ;;  %2989 = vmatprep.subr.bf16.mxu1 %v3913_v14  ;;  %vm4357_vm14 = vcmask 1046528   ;;  %s2581_s25 = sshll.u32 %s3560_s17, 10 }
  0xaf   : > { %v610_v29 = vsel %vm3903_vm2, %v597_v11, %v609_v23  ;;  %v628_v33 = vrot.slane %v627_v24, 4  ;;  %v643_v35 = vsel %vm3879_vm8, %v623_v18, %v642_v30  ;;  %v477_v45 = vld [vmem:[#allocation9 + $0x40] sm:$0xff]  ;;  %v478_v47 = vld [vmem:[#allocation9 + $0x48] sm:$0xff]  ;;  %v480_v52 = vld [vmem:[#allocation9 + $0x58] sm:$0xff]  ;;  %s2362_s26 = sshll.u32 %s4252_s21, 4  ;;  %s4457_s30 = sld [smem:[#allocation19_spill]]  ;;  %s4289_s26 = int_to_ptr.vmem [resolvable:$true] %s2362_s26 }
  0xb0   : > { %611 = vst [vmem:[#allocation2 + $0x18] sm:$0x7] %v610_v29  ;;  %v638_v34 = vrot.slane %v637_v26, 4  ;;  %v647_v36 = vld [vmem:[#allocation2 + $0x20] sm:$0xf]  ;;  %2959 = vmatpush3.bf16.msra.mxu0 %v3913_v14  ;;  %v3965_v50 = vpack.c.bf16 %v478_v47, %v477_v45  ;;  %v3971_v53 = vpack.c.bf16 %v480_v52, %v479_v51  ;;  %v481_v54 = vld [vmem:[#allocation9 + $0x60] sm:$0xff] }
  0xb1   : > { %644 = vst [vmem:[#allocation2 + $0x18] sm:$0x8] %v643_v35  ;;  %v633_v38 = vsel %vm3917_vm3, %v628_v33, %v632_v20  ;;  %2991 = vmatpush3.bf16.msra.mxu1 %v3913_v14  ;;  %2961 = vmatprep.subr.bf16.mxu0 %v3937_v37  ;;  %v482_v55 = vld [vmem:[#allocation9 + $0x68] sm:$0xff]  ;;  %v483_v57 = vld [vmem:[#allocation9 + $0x70] sm:$0xff]  ;;  %v484_v58 = vld [vmem:[#allocation9 + $0x78] sm:$0xff]  ;;  %vm4431_vm3 = vcmask 1046528  }
  0xb2   : > { %v648_v39 = vsel %vm3926_vm15, %v638_v34, %v647_v36  ;;  %645 = vst [vmem:[#allocation2 + $0x1c] sm:$0xf] %v633_v38  ;;  %2993 = vmatprep.subr.bf16.mxu1 %v3937_v37  ;;  %v3200_v42 = vld [vmem:[#allocation2 + $0x10] sm:$0xff]   ;;  %v3977_v56 = vpack.c.bf16 %v482_v55, %v481_v54  ;;  %v3983_v59 = vpack.c.bf16 %v484_v58, %v483_v57  ;;  %v3995_v23 = vld [vmem:[%s4337_s2] ss:$0 sm:$0xff]  ;;  %s2349_s17 = scalar_lea.sflag [#allocation5], %s3738_s13 }
  0xb3   : > { %649 = vst [vmem:[#allocation2 + $0x20] sm:$0xf] %v648_v39  ;;  %2725 = vmatmul.mubr.bf16.gmra.mrb[4].mxu1 %v3199_v28  ;;  %890 = vmatmul.mubr.bf16.gmra.mrb[4].mxu0 %v3199_v28  ;;  %s3394_s12 = scalar_lea.vmem %s4289_s26, 1024 }
  0xb4   : > { %2728 = vmatprep.mubr.msk.bf16.mxu1 %vm4425_vm11, %v3478_v0  ;;  %899 = vmatprep.mubr.bf16.mxu0 %v3480_v1  ;;  %p3395_p10 = scmp.ne.s32.totalorder %s4289_s26, %s3394_s12 }
  0xb5   : > { %2963 = vmatpush3.bf16.msra.mxu0 %v3937_v37  ;;  %2995 = vmatpush3.bf16.msra.mxu1 %v3937_v37  ;;  %s4287_s10 = scalar_lea.hbm %s4457_s30, %s2581_s25 }
  0xb6   : > { %2965 = vmatprep.subr.bf16.mxu0 %v3947_v41  ;;  %2997 = vmatprep.subr.bf16.mxu1 %v3947_v41  ;;  %p3396_p3 = pnand %p3395_p10, %p3687_p5 }
  0xb8   : > { %p3397_p7 = pneg %p3396_p3 }
  0xb9   : > { %2967 = vmatpush3.bf16.msra.mxu0 %v3947_v41  ;;  %2999 = vmatpush3.bf16.msra.mxu1 %v3947_v41  ;;  %v3201_v43 = vld [vmem:[#allocation2 + $0x18] sm:$0xff]  }
  0xba   : > { %v3202_v44 = vld [vmem:[#allocation2 + $0x20] ss:$0 sps:$4 sm:$0xff]   ;;  %2969 = vmatprep.subr.bf16.mxu0 %v3965_v50  ;;  %3001 = vmatprep.subr.bf16.mxu1 %v3965_v50 }
  0xbb   : > { %2729 = vmatmul.mubr.bf16.gmra.mrb[8].mxu1 %v3200_v42  ;;  %900 = vmatmul.mubr.bf16.gmra.mrb[8].mxu0 %v3200_v42  ;;  %v1559_v25 = vld [vmem:[#allocation2 + $0x20] sm:$0xf] }
  0xbc   : > { %2732 = vmatprep.mubr.msk.bf16.mxu1 %vm4425_vm11, %v3478_v0  ;;  %909 = vmatprep.mubr.bf16.mxu0 %v3480_v1 }
  0xbd   : > { %2971 = vmatpush3.bf16.msra.mxu0 %v3965_v50  ;;  %3003 = vmatpush3.bf16.msra.mxu1 %v3965_v50 }
  0xbe   : > { %2973 = vmatprep.subr.bf16.mxu0 %v3971_v53  ;;  %3005 = vmatprep.subr.bf16.mxu1 %v3971_v53 }
  0xc1   : > { %2975 = vmatpush3.bf16.msra.mxu0 %v3971_v53  ;;  %3007 = vmatpush3.bf16.msra.mxu1 %v3971_v53 }
  0xc2   : > { %2977 = vmatprep.subr.bf16.mxu0 %v3977_v56  ;;  %3009 = vmatprep.subr.bf16.mxu1 %v3977_v56 }
  0xc3   : > { %2733 = vmatmul.mubr.bf16.gmra.mrb[12].mxu1 %v3201_v43  ;;  %910 = vmatmul.mubr.bf16.gmra.mrb[12].mxu0 %v3201_v43 }
  0xc4   : > { %2736 = vmatprep.mubr.msk.bf16.mxu1 %vm4425_vm11, %v3478_v0  ;;  %919 = vmatprep.mubr.bf16.mxu0 %v3480_v1 }
  0xc5   : > { %2979 = vmatpush3.bf16.msra.mxu0 %v3977_v56  ;;  %3011 = vmatpush3.bf16.msra.mxu1 %v3977_v56 }
  0xc6   : > { %2981 = vmatprep.subr.bf16.mxu0 %v3983_v59  ;;  %3013 = vmatprep.subr.bf16.mxu1 %v3983_v59 }
  0xc9   : > { %2983 = vmatpush3.bf16.msra.mxu0 %v3983_v59  ;;  %3015 = vmatpush3.bf16.msra.mxu1 %v3983_v59 }
  0xca   : > { %2828 = vmatprep.subr.bf16.mxu1 %v3478_v0 }
  0xcb   : > { %2737 = vmatmul.mubr.bf16.gmra.mrb[16].mxu1 %v3202_v44  ;;  %920 = vmatmul.mubr.bf16.gmra.mrb[16].mxu0 %v3202_v44 }
 0x17e   : > { %v881_v61 = vpop.f32.mrb[0].mxu0  ;;  %v962_v62 = vpop.f32.mrb[0].mxu1 }
 0x17f   : > { %v1017_v63 = vrot.slane %v962_v62, 2  ;;  %v883_v2 = vpop.f32.mrb[1].mxu0  ;;  %v2722_v3 = vpop.f32.mrb[1].mxu1 }
 0x180   : > { %v885_v6 = vpop.f32.mrb[2].mxu0  ;;  %v965_v7 = vpop.f32.mrb[2].mxu1  ;;  %v1004_v12 = vrot.slane %v883_v2, 1 }
 0x181   : > { %v1018_v8 = vrot.slane %v965_v7, 2  ;;  %v887_v9 = vpop.f32.mrb[3].mxu0  ;;  %v2723_v11 = vpop.f32.mrb[3].mxu1 }
 0x182   : > { %v1005_v15 = vrot.slane %v887_v9, 1 }
 0x183   : > { %v1019_v16 = vsel %vm4359_vm13, %v1017_v63, %v1018_v8 }
 0x184   : > { %v1006_v18 = vsel %vm4357_vm14, %v1004_v12, %v1005_v15 }
 0x185   : > { %v1011_v19 = vadd.f32 %v1006_v18, %v881_v61 }
 0x186   : > { %v970_v20 = vpop.f32.mrb[4].mxu1  ;;  %v891_v22 = vpop.f32.mrb[4].mxu0 }
 0x187   : > { %v1020_v24 = vrot.slane %v970_v20, 2  ;;  %v893_v26 = vpop.f32.mrb[5].mxu0  ;;  %v2726_v28 = vpop.f32.mrb[5].mxu1  ;;  %v1024_v29 = vadd.f32 %v1019_v16, %v1011_v19 }
 0x188   : > { %v1007_v30 = vrot.slane %v893_v26, 1  ;;  %v895_v31 = vpop.f32.mrb[6].mxu0  ;;  %v973_v32 = vpop.f32.mrb[6].mxu1 }
 0x189   : > { %v1021_v33 = vsel %vm4359_vm13, %v1018_v8, %v1020_v24  ;;  %v1040_v34 = vrot.slane %v973_v32, 2  ;;  %v897_v35 = vpop.f32.mrb[7].mxu0  ;;  %v2727_v36 = vpop.f32.mrb[7].mxu1  ;;  %v3999_v38 = vadd.f32 %v3995_v23, %v1024_v29 }
 0x18a   : > { %v1008_v39 = vsel %vm4357_vm14, %v1005_v15, %v1007_v30  ;;  %v1028_v42 = vrot.slane %v897_v35, 1 }
 0x18b   : > { %v1012_v43 = vadd.f32 %v1008_v39, %v885_v6  ;;  %v1041_v44 = vsel %vm4359_vm13, %v1020_v24, %v1040_v34  ;;  %2772 = vmatprep.mubr.f32.mxu0 %v3999_v38 }
 0x18c   : > { %v1029_v45 = vsel %vm4357_vm14, %v1007_v30, %v1028_v42 }
 0x18d   : > { %v1025_v47 = vadd.f32 %v1021_v33, %v1012_v43  ;;  %v1035_v51 = vadd.f32 %v1029_v45, %v891_v22 }
 0x18e   : > { %v978_v52 = vpop.f32.mrb[8].mxu1  ;;  %v901_v54 = vpop.f32.mrb[8].mxu0 }
 0x18f   : > { %v4006_v55 = vadd.f32 %v3995_v23, %v1025_v47  ;;  %v1047_v57 = vadd.f32 %v1041_v44, %v1035_v51  ;;  %v1042_v58 = vrot.slane %v978_v52, 2  ;;  %v903_v61 = vpop.f32.mrb[9].mxu0  ;;  %v2730_v62 = vpop.f32.mrb[9].mxu1 }
 0x190   : > { %v1030_v63 = vrot.slane %v903_v61, 1  ;;  %v905_v2 = vpop.f32.mrb[10].mxu0  ;;  %v981_v3 = vpop.f32.mrb[10].mxu1 }
 0x191   : > { %v1043_v6 = vsel %vm4359_vm13, %v1040_v34, %v1042_v58  ;;  %v1064_v7 = vrot.slane %v981_v3, 2  ;;  %v907_v8 = vpop.f32.mrb[11].mxu0  ;;  %v2731_v9 = vpop.f32.mrb[11].mxu1  ;;  %2773 = vmatmul.mubr.f32.vlgmr.msra.gmra.mrb[20].mxu0 %v4006_v55  ;;  %v1100_v26 = vrot.slane %v1047_v57, 2 }
 0x192   : > { %v1031_v11 = vsel %vm4357_vm14, %v1028_v42, %v1030_v63  ;;  %v1037_v12 = vadd.f32 %v1030_v63, %v901_v54  ;;  %v1052_v15 = vrot.slane %v907_v8, 1 }
 0x193   : > { %v1036_v16 = vadd.f32 %v1031_v11, %v895_v31  ;;  %v1065_v18 = vsel %vm4359_vm13, %v1042_v58, %v1064_v7 }
 0x194   : > { %v1049_v19 = vadd.f32 %v1042_v58, %v1037_v12  ;;  %v1053_v20 = vsel %vm4357_vm14, %v1030_v63, %v1052_v15 }
 0x195   : > { %v1048_v22 = vadd.f32 %v1043_v6, %v1036_v16  ;;  %v1059_v24 = vadd.f32 %v1053_v20, %v901_v54 }
 0x196   : > { %v986_v28 = vpop.f32.mrb[12].mxu1  ;;  %v911_v29 = vpop.f32.mrb[12].mxu0  ;;  %v1103_v32 = vrot.slane %v1049_v19, 2 }
 0x197   : > { %v1101_v30 = vrot.slane %v1048_v22, 2  ;;  %v1071_v33 = vadd.f32 %v1065_v18, %v1059_v24  ;;  %v1066_v34 = vrot.slane %v986_v28, 2  ;;  %v913_v35 = vpop.f32.mrb[13].mxu0  ;;  %v2734_v36 = vpop.f32.mrb[13].mxu1 }
 0x198   : > { %v1054_v39 = vrot.slane %v913_v35, 1  ;;  %v915_v42 = vpop.f32.mrb[14].mxu0  ;;  %v989_v43 = vpop.f32.mrb[14].mxu1 }
 0x199   : > { %v1067_v31 = vsel %vm4359_vm13, %v1064_v7, %v1066_v34  ;;  %v917_v44 = vpop.f32.mrb[15].mxu0  ;;  %v2735_v45 = vpop.f32.mrb[15].mxu1  ;;  %v1102_v47 = vsel %vm4359_vm13, %v1100_v26, %v1101_v30  ;;  %v1104_v61 = vsel %vm4359_vm13, %v1101_v30, %v1103_v32  ;;  %v1088_v7 = vrot.slane %v989_v43, 2 }
 0x19a   : > { %v1055_v51 = vsel %vm4357_vm14, %v1052_v15, %v1054_v39  ;;  %v1061_v52 = vadd.f32 %v1054_v39, %v911_v29  ;;  %v1076_v54 = vrot.slane %v917_v44, 1  ;;  %v1138_v57 = vadd.f32 %v3995_v23, %v1102_v47 }
 0x19b   : > { %v1060_v58 = vadd.f32 %v1055_v51, %v905_v2  ;;  %v1139_v3 = vadd.f32 %v3995_v23, %v1104_v61  ;;  %v1111_v15 = vrot.slane %v1071_v33, 4 }
 0x19c   : > { %v1073_v62 = vadd.f32 %v1066_v34, %v1061_v52  ;;  %v1077_v63 = vsel %vm4357_vm14, %v1054_v39, %v1076_v54  ;;  %2775 = vmatprep.mubr.f32.mxu0 %v1138_v57  ;;  %vm4430_vm14 = vmmov %vm4427_vm0 }
 0x19d   : > { %v1072_v6 = vadd.f32 %v1067_v31, %v1060_v58  ;;  %v1083_v8 = vadd.f32 %v1077_v63, %v911_v29  ;;  %2776 = vmatmul.mubr.f32.gmra.mrb[22].mxu0 %v1139_v3 }
 0x19e   : > { %v1114_v9 = vrot.slane %v1073_v62, 4  ;;  %v994_v11 = vpop.f32.mrb[16].mxu1  ;;  %v921_v12 = vpop.f32.mrb[16].mxu0 }
 0x19f   : > { %v1112_v16 = vrot.slane %v1072_v6, 4  ;;  %v1094_v18 = vadd.f32 %v1088_v7, %v1083_v8  ;;  %v1089_v19 = vrot.slane %v994_v11, 2  ;;  %v923_v2 = vpop.f32.mrb[17].mxu0  ;;  %v2738_v20 = vpop.f32.mrb[17].mxu1 }
 0x1a0   : > { %v1078_v22 = vrot.slane %v923_v2, 1  ;;  %v925_v24 = vpop.f32.mrb[18].mxu0  ;;  %v997_v26 = vpop.f32.mrb[18].mxu1 }
 0x1a1   : > { %v1090_v28 = vsel %vm4359_vm13, %v1088_v7, %v1089_v19  ;;  %v926_v30 = vpop.f32.mrb[19].mxu0  ;;  %v2739_v32 = vpop.f32.mrb[19].mxu1  ;;  %v1113_v34 = vsel %vm4427_vm0, %v1111_v15, %v1112_v16  ;;  %v1115_v29 = vsel %vm4430_vm14, %v1112_v16, %v1114_v9  ;;  %v1122_v47 = vrot.slane %v1094_v18, 6 }
 0x1a2   : > { %v1079_v35 = vsel %vm4431_vm3, %v1076_v54, %v1078_v22  ;;  %v1085_v36 = vadd.f32 %v1078_v22, %v921_v12  ;;  %v1140_v33 = vadd.f32 %v3995_v23, %v1113_v34  ;;  %v1141_v39 = vadd.f32 %v3995_v23, %v1115_v29  ;;  %v3205_v30 = vld [vmem:[#allocation8 + $0x4] ss:$12 sps:$4 sm:$0xff]   ;;  %v3203_v32 = vld [vmem:[#allocation8] ss:$12 sps:$4 sm:$0xff]   ;;  %v3206_v34 = vld [vmem:[#allocation8 + $0x8] ss:$12 sps:$4 sm:$0xff]  }
 0x1a3   : > { %v1084_v43 = vadd.f32 %v1079_v35, %v915_v42  ;;  %vm4432_vm13 = vcmask 1041408   ;;  %1759 = vmatprep.subr.bf16.mxu0 %v3205_v30  ;;  %v3209_v29 = vld [vmem:[#allocation8 + $0x1c] ss:$12 sps:$4 sm:$0xff]   ;;  %v3207_v35 = vld [vmem:[#allocation8 + $0x18] ss:$12 sps:$4 sm:$0xff]  }
 0x1a4   : > { %v1096_v31 = vadd.f32 %v1089_v19, %v1085_v36  ;;  %2778 = vmatprep.mubr.f32.mxu0 %v1140_v33  ;;  %vm4433_vm0 = vmmov %vm4432_vm13  ;;  %1760 = vmatpush1.bf16.msra.mxu0 %v3203_v32  ;;  %v3210_v36 = vld [vmem:[#allocation8 + $0x20] ss:$12 sps:$4 sm:$0xff]   ;;  %v4085_v32 = vld [vmem:[%s4339_s4] ss:$0 sm:$0xff] }
 0x1a5   : > { %v1095_v44 = vadd.f32 %v1090_v28, %v1084_v43  ;;  %2779 = vmatmul.mubr.f32.gmra.mrb[24].mxu0 %v1141_v39  ;;  %1761 = vmatprep.subr.bf16.mxu0 %v3209_v29  ;;  %v3214_v43 = vld [vmem:[#allocation8 + $0x38] ss:$12 sps:$4 sm:$0xff]  }
 0x1a6   : > { %v1125_v45 = vrot.slane %v1096_v31, 6  ;;  %v3217_v31 = vld [vmem:[#allocation8 + $0x4c] ss:$12 sps:$4 sm:$0xff]  }
 0x1a7   : > { %v1123_v51 = vrot.slane %v1095_v44, 6  ;;  %v3215_v44 = vld [vmem:[#allocation8 + $0x48] ss:$12 sps:$4 sm:$0xff]  }
 0x1a8   : > { %1762 = vmatpush1.bf16.msra.mxu0 %v3207_v35 }
 0x1a9   : > { %v1124_v52 = vsel %vm4432_vm13, %v1122_v47, %v1123_v51  ;;  %v1126_v58 = vsel %vm4433_vm0, %v1123_v51, %v1125_v45  ;;  %v3218_v45 = vld [vmem:[#allocation8 + $0x50] ss:$12 sps:$4 sm:$0xff]   ;;  %v3219_v51 = vld [vmem:[#allocation8 + $0x60] ss:$12 sps:$4 sm:$0xff]  }
 0x1aa   : > { %v1142_v61 = vadd.f32 %v3995_v23, %v1124_v52  ;;  %v1143_v54 = vadd.f32 %v3995_v23, %v1126_v58  ;;  %v3221_v47 = vld [vmem:[#allocation8 + $0x64] ss:$12 sps:$4 sm:$0xff]   ;;  %v3222_v52 = vld [vmem:[#allocation8 + $0x68] ss:$12 sps:$4 sm:$0xff]  }
 0x1ab   : > { %v3225_v58 = vld [vmem:[#allocation8 + $0x7c] ss:$12 sps:$4 sm:$0xff]  }
 0x1ac   : > { %2781 = vmatprep.mubr.f32.mxu0 %v1142_v61 }
 0x1ad   : > { %2782 = vmatmul.mubr.f32.gmra.mrb[26].mxu0 %v1143_v54 }
 0x1ae   : > { %1791 = vmatprep.mubr.bf16.mxu0 %v3480_v1 }
 0x264   : > { %v2774_v42 = vpop.f32.mrb[20].mxu0 }
 0x265   : > { %v4032_v62 = vsub.f32 %v4006_v55, %v2774_v42  ;;  %v1210_v63 = vpop.f32.mrb[21].mxu0  ;;  %v3229_v42 = vld [vmem:[#allocation8 + $0x94] ss:$12 sps:$4 sm:$0xff]  }
 0x266   : > { %v4035_v6 = vsub.f32 %v3999_v38, %v1210_v63  ;;  %v3227_v63 = vld [vmem:[#allocation8 + $0x90] ss:$12 sps:$4 sm:$0xff]  }
 0x267   : > { %v1258_v8 = vmul.f32 %v4032_v62, %v4032_v62 }
 0x268   : > { %v1257_v7 = vmul.f32 %v4035_v6, %v4035_v6 }
 0x26a   : > { %2816 = vmatprep.mubr.f32.mxu1 %v1257_v7  ;;  %v3230_v7 = vld [vmem:[#allocation8 + $0x98] ss:$12 sps:$4 sm:$0xff]  }
 0x26b   : > { %2817 = vmatmul.mubr.f32.vlgmr.msra.gmra.mrb[20].mxu1 %v1258_v8  ;;  %v3233_v8 = vld [vmem:[#allocation8 + $0xac] ss:$12 sps:$4 sm:$0xff]  }
 0x26c   : > { %2829 = vmatpush3.bf16.msra.mxu1 %v3206_v34 }
 0x26d   : > { %2830 = vmatprep.subr.bf16.mxu1 %v3478_v0 }
 0x270   : > { %v2777_v23 = vpop.f32.mrb[22].mxu0  ;;  %2831 = vmatpush3.bf16.msra.mxu1 %v3210_v36 }
 0x271   : > { %v4041_v9 = vsub.f32 %v1139_v3, %v2777_v23  ;;  %v1220_v11 = vpop.f32.mrb[23].mxu0  ;;  %2832 = vmatprep.subr.bf16.mxu1 %v3478_v0  ;;  %v3231_v23 = vld [vmem:[#allocation8 + $0xa8] ss:$12 sps:$4 sm:$0xff]  }
 0x272   : > { %v4043_v12 = vsub.f32 %v1138_v57, %v1220_v11  ;;  %v3234_v11 = vld [vmem:[#allocation8 + $0xb0] ss:$12 sps:$4 sm:$0xff]  }
 0x273   : > { %v1260_v38 = vmul.f32 %v4041_v9, %v4041_v9 }
 0x274   : > { %v1259_v55 = vmul.f32 %v4043_v12, %v4043_v12  ;;  %2833 = vmatpush3.bf16.msra.mxu1 %v3214_v43 }
 0x275   : > { %2834 = vmatprep.subr.bf16.mxu1 %v3478_v0 }
 0x276   : > { %2819 = vmatprep.mubr.f32.mxu1 %v1259_v55 }
 0x277   : > { %2820 = vmatmul.mubr.f32.gmra.mrb[22].mxu1 %v1260_v38 }
 0x278   : > { %v2780_v15 = vpop.f32.mrb[24].mxu0  ;;  %2835 = vmatpush3.bf16.msra.mxu1 %v3218_v45 }
 0x279   : > { %v4049_v16 = vsub.f32 %v1141_v39, %v2780_v15  ;;  %v1230_v18 = vpop.f32.mrb[25].mxu0  ;;  %v3211_v39 = vld [vmem:[#allocation8 + $0x30] ss:$12 sps:$4 sm:$0xff]   ;;  %2836 = vmatprep.subr.bf16.mxu1 %v3478_v0 }
 0x27a   : > { %v4051_v19 = vsub.f32 %v1140_v33, %v1230_v18  ;;  %v3213_v33 = vld [vmem:[#allocation8 + $0x34] ss:$12 sps:$4 sm:$0xff]  }
 0x27b   : > { %v1262_v57 = vmul.f32 %v4049_v16, %v4049_v16  ;;  %1763 = vmatprep.subr.bf16.mxu0 %v3213_v33 }
 0x27c   : > { %v1261_v3 = vmul.f32 %v4051_v19, %v4051_v19  ;;  %1764 = vmatpush1.bf16.msra.mxu0 %v3211_v39  ;;  %2837 = vmatpush3.bf16.msra.mxu1 %v3222_v52 }
 0x27d   : > { %1765 = vmatprep.subr.bf16.mxu0 %v3217_v31  ;;  %2838 = vmatprep.subr.bf16.mxu1 %v3478_v0 }
 0x27e   : > { %2822 = vmatprep.mubr.f32.mxu1 %v1261_v3 }
 0x27f   : > { %2823 = vmatmul.mubr.f32.gmra.mrb[24].mxu1 %v1262_v57  ;;  %v4079_v57 = vld [vmem:[%s4338_s3] ss:$0 sm:$0xff] }
 0x280   : > { %v2783_v2 = vpop.f32.mrb[26].mxu0  ;;  %1766 = vmatpush1.bf16.msra.mxu0 %v3215_v44 }
 0x281   : > { %v4057_v20 = vsub.f32 %v1143_v54, %v2783_v2  ;;  %v1240_v22 = vpop.f32.mrb[27].mxu0  ;;  %1767 = vmatprep.subr.bf16.mxu0 %v3221_v47  ;;  %v3226_v54 = vld [vmem:[#allocation8 + $0x80] ss:$12 sps:$4 sm:$0xff]  }
 0x282   : > { %v4059_v24 = vsub.f32 %v1142_v61, %v1240_v22  ;;  %v3223_v61 = vld [vmem:[#allocation8 + $0x78] ss:$12 sps:$4 sm:$0xff]   ;;  %2839 = vmatpush3.bf16.msra.mxu1 %v3226_v54 }
 0x283   : > { %v1264_v28 = vmul.f32 %v4057_v20, %v4057_v20  ;;  %2840 = vmatprep.subr.bf16.mxu1 %v3478_v0 }
 0x284   : > { %v1263_v26 = vmul.f32 %v4059_v24, %v4059_v24  ;;  %1768 = vmatpush1.bf16.msra.mxu0 %v3219_v51 }
 0x285   : > { %1769 = vmatprep.subr.bf16.mxu0 %v3225_v58 }
 0x286   : > { %2825 = vmatprep.mubr.f32.mxu1 %v1263_v26  ;;  %2841 = vmatpush3.bf16.msra.mxu1 %v3230_v7  ;;  %v1454_v7 = vld [vmem:[#allocation2 + $0x8] sm:$0x1] }
 0x287   : > { %2826 = vmatmul.mubr.f32.gmra.mrb[26].mxu1 %v1264_v28  ;;  %2842 = vmatprep.subr.bf16.mxu1 %v3478_v0 }
 0x288   : > { %2844 = vmatprep.mubr.msk.bf16.mxu1 %vm4425_vm11, %v3478_v0  ;;  %1770 = vmatpush1.bf16.msra.mxu0 %v3223_v61 }
 0x289   : > { %1771 = vmatprep.subr.bf16.mxu0 %v3229_v42 }
 0x28a   : > { %2843 = vmatpush3.bf16.msra.mxu1 %v3234_v11 }
 0x28b   : > { %3049 = vmatprep.subr.bf16.mxu1 %v3899_v60 }
 0x28c   : > { %1772 = vmatpush1.bf16.msra.mxu0 %v3227_v63 }
 0x28d   : > { %1773 = vmatprep.subr.bf16.mxu0 %v3233_v8 }
 0x290   : > { %1774 = vmatpush1.bf16.msra.mxu0 %v3231_v23 }
 0x291   : > { %3017 = vmatprep.subr.bf16.mxu0 %v3899_v60 }
 0x33e   : > { %v2818_v55 = vpop.f32.mrb[20].mxu1 }
 0x33f   : > { %v1337_v38 = vadd.f32 1e-05, %v2818_v55  ;;  %v1331_v15 = vpop.f32.mrb[21].mxu1 }
 0x340   : > { %v1332_v18 = vadd.f32 1e-05, %v1331_v15  ;;  %v1450_v15 = vld [vmem:[#allocation2] sm:$0xf] }
 0x341   : > { %3240 = vrsqrt.f32 %v1337_v38 }
 0x342   : > { %3242 = vrsqrt.f32 %v1332_v18 }
 0x34a   : > { %v2821_v2 = vpop.f32.mrb[22].mxu1 }
 0x34b   : > { %v3241_v3 = vpop.eup %3240  ;;  %v1347_v28 = vadd.f32 1e-05, %v2821_v2  ;;  %v1341_v30 = vpop.f32.mrb[23].mxu1 }
 0x34c   : > { %v3243_v22 = vpop.eup %3242  ;;  %v1379_v26 = vmul.f32 %v3241_v3, %v4032_v62  ;;  %v1342_v29 = vadd.f32 1e-05, %v1341_v30 }
 0x34d   : > { %v1378_v34 = vmul.f32 %v3243_v22, %v4035_v6  ;;  %3244 = vrsqrt.f32 %v1347_v28 }
 0x34e   : > { %v1394_v35 = vmul.f32 %v4079_v57, %v1379_v26  ;;  %3246 = vrsqrt.f32 %v1342_v29 }
 0x34f   : > { %v1393_v36 = vmul.f32 %v4079_v57, %v1378_v34 }
 0x350   : > { %v1409_v33 = vadd.f32 %v4085_v32, %v1394_v35 }
 0x351   : > { %v1408_v62 = vadd.f32 %v4085_v32, %v1393_v36 }
 0x352   : > { %v1417_v39 = vmax.f32 %v1409_v33, 0.0  ;;  %v2824_v43 = vpop.f32.mrb[24].mxu1 }
 0x353   : > { %v1416_v31 = vmax.f32 %v1408_v62, 0.0  ;;  %v1357_v44 = vadd.f32 1e-05, %v2824_v43  ;;  %v1351_v45 = vpop.f32.mrb[25].mxu1 }
 0x354   : > { %v2574_v47 = vpack.c.bf16 %v1417_v39, %v1417_v39  ;;  %v1352_v51 = vadd.f32 1e-05, %v1351_v45 }
 0x355   : > { %v2573_v52 = vpack.c.bf16 %v1416_v31, %v1416_v31  ;;  %3248 = vrsqrt.f32 %v1357_v44 }
 0x356   : > { %v1439_v6 = vshrl.u32 %v2574_v47, 16  ;;  %3250 = vrsqrt.f32 %v1352_v51  ;;  %v1442_v42 = vshll.u32 %v2574_v47, 16 }
 0x357   : > { %v1431_v58 = vshrl.u32 %v2573_v52, 16  ;;  %v3245_v61 = vpop.eup %3244  ;;  %v1434_v23 = vshll.u32 %v2573_v52, 16 }
 0x358   : > { %v1441_v54 = vrot.slane %v1439_v6, 7  ;;  %v3247_v63 = vpop.eup %3246  ;;  %v1381_v11 = vmul.f32 %v3245_v61, %v4041_v9 }
 0x359   : > { %v1433_v8 = vrot.slane %v1431_v58, 7  ;;  %v1380_v18 = vmul.f32 %v3247_v63, %v4043_v12 }
 0x35a   : > { %v1444_v55 = vor.u32 %v1442_v42, %v1441_v54  ;;  %v1446_v38 = vrot.slane %v1441_v54, 4  ;;  %v2827_v3 = vpop.f32.mrb[26].mxu1  ;;  %v1396_v26 = vmul.f32 %v4079_v57, %v1381_v11 }
 0x35b   : > { %v1436_v2 = vor.u32 %v1434_v23, %v1433_v8  ;;  %v1437_v22 = vrot.slane %v1433_v8, 4  ;;  %v1367_v28 = vadd.f32 1e-05, %v2827_v3  ;;  %v1361_v30 = vpop.f32.mrb[27].mxu1  ;;  %v1395_v29 = vmul.f32 %v4079_v57, %v1380_v18  ;;  %v1489_v18 = vld [vmem:[#allocation2 + $0x10] sm:$0x3] }
 0x35c   : > { %v1455_v34 = vsel %vm3766_vm6, %v1446_v38, %v1454_v7  ;;  %v1362_v35 = vadd.f32 1e-05, %v1361_v30  ;;  %v1411_v36 = vadd.f32 %v4085_v32, %v1396_v26  ;;  %vm4435_vm6 = vcmask 1045504  }
 0x35d   : > { %1456 = vst [vmem:[#allocation2 + $0x8] sm:$0x1] %v1455_v34  ;;  %v1445_v9 = vsel %vm3786_vm5, %v1437_v22, %v1444_v55  ;;  %v1451_v12 = vsel %vm3809_vm7, %v1436_v2, %v1450_v15  ;;  %3252 = vrsqrt.f32 %v1367_v28  ;;  %v1410_v33 = vadd.f32 %v4085_v32, %v1395_v29  ;;  %v1485_v55 = vld [vmem:[#allocation2 + $0x8] sm:$0xe] }
 0x35e   : > { %1452 = vst [vmem:[#allocation2] sm:$0xf] %v1451_v12  ;;  %1453 = vst [vmem:[#allocation2 + $0x4] sm:$0xf] %v1445_v9  ;;  %3254 = vrsqrt.f32 %v1362_v35  ;;  %v1419_v62 = vmax.f32 %v1411_v36, 0.0  ;;  %vm4434_vm5 = vnez %v4424_v17 }
 0x35f   : > { %v3249_v13 = vpop.eup %3248  ;;  %v1418_v43 = vmax.f32 %v1410_v33, 0.0 }
 0x360   : > { %v3251_v39 = vpop.eup %3250  ;;  %v1383_v31 = vmul.f32 %v3249_v13, %v4049_v16  ;;  %v2576_v44 = vpack.c.bf16 %v1419_v62, %v1419_v62 }
 0x361   : > { %v1382_v21 = vmul.f32 %v3251_v39, %v4051_v19  ;;  %v2575_v45 = vpack.c.bf16 %v1418_v43, %v1418_v43 }
 0x362   : > { %v1398_v46 = vmul.f32 %v4079_v57, %v1383_v31  ;;  %v1473_v47 = vshrl.u32 %v2576_v44, 16  ;;  %v1476_v51 = vshll.u32 %v2576_v44, 16  ;;  %v1520_v31 = vld [vmem:[#allocation2 + $0x10] sm:$0xc] }
 0x363   : > { %v1397_v52 = vmul.f32 %v4079_v57, %v1382_v21  ;;  %v1464_v6 = vshrl.u32 %v2575_v45, 16  ;;  %v1467_v58 = vshll.u32 %v2575_v45, 16  ;;  %v1524_v21 = vld [vmem:[#allocation2 + $0x18] sm:$0x7] }
 0x364   : > { %v1413_v61 = vadd.f32 %v4085_v32, %v1398_v46  ;;  %v1475_v54 = vrot.slane %v1473_v47, 6  ;;  %v1478_v42 = vrot.slane %v1476_v51, 7 }
 0x365   : > { %v1412_v63 = vadd.f32 %v4085_v32, %v1397_v52  ;;  %v1466_v7 = vrot.slane %v1464_v6, 6  ;;  %v1469_v16 = vrot.slane %v1467_v58, 7  ;;  %v3235_v23 = vld [vmem:[#allocation2] sm:$0xff]  }
 0x366   : > { %v1421_v8 = vmax.f32 %v1413_v61, 0.0  ;;  %v1479_v11 = vor.u32 %v1478_v42, %v1475_v54  ;;  %1792 = vmatmul.mubr.bf16.vlgmr.msra.gmra.mrb[28].mxu0 %v3235_v23  ;;  %2845 = vmatmul.mubr.bf16.vlgmr.msra.gmra.mrb[28].mxu1 %v3235_v23 }
 0x367   : > { %v3253_v19 = vpop.eup %3252  ;;  %v1420_v38 = vmax.f32 %v1412_v63, 0.0  ;;  %v1470_v3 = vor.u32 %v1469_v16, %v1466_v7  ;;  %1801 = vmatprep.mubr.bf16.mxu0 %v3480_v1  ;;  %2848 = vmatprep.mubr.msk.bf16.mxu1 %vm4425_vm11, %v3478_v0  ;;  %v1555_v7 = vld [vmem:[#allocation2 + $0x18] sm:$0x8] }
 0x368   : > { %v3255_v15 = vpop.eup %3254  ;;  %v2578_v2 = vpack.c.bf16 %v1421_v8, %v1421_v8  ;;  %v1385_v22 = vmul.f32 %v3253_v19, %v4057_v20  ;;  %v1481_v26 = vrot.slane %v1479_v11, 4  ;;  %3019 = vmatpush3.bf16.msra.mxu0 %v3899_v60  ;;  %3051 = vmatpush3.bf16.msra.mxu1 %v3899_v60 }
 0x369   : > { %v2577_v28 = vpack.c.bf16 %v1420_v38, %v1420_v38  ;;  %v1384_v30 = vmul.f32 %v3255_v15, %v4059_v24  ;;  %v1471_v34 = vrot.slane %v1470_v3, 4  ;;  %v1486_v29 = vsel %vm3834_vm10, %v1470_v3, %v1485_v55  ;;  %3021 = vmatprep.subr.bf16.mxu0 %v3913_v14  ;;  %3053 = vmatprep.subr.bf16.mxu1 %v3913_v14 }
 0x36a   : > { %v1508_v35 = vshrl.u32 %v2578_v2, 16  ;;  %v1511_v9 = vshll.u32 %v2578_v2, 16  ;;  %v1490_v20 = vsel %vm3840_vm4, %v1481_v26, %v1489_v18  ;;  %1487 = vst [vmem:[#allocation2 + $0x8] sm:$0xe] %v1486_v29  ;;  %v1400_v36 = vmul.f32 %v4079_v57, %v1385_v22  ;;  %v4181_v29 = vld [vmem:[%s4341_s6] ss:$0 sm:$0xff]  ;;  %vm4437_vm4 = vmmov %vm4435_vm6 }
 0x36b   : > { %v1499_v24 = vshrl.u32 %v2577_v28, 16  ;;  %v1502_v12 = vshll.u32 %v2577_v28, 16  ;;  %1491 = vst [vmem:[#allocation2 + $0x10] sm:$0x3] %v1490_v20  ;;  %v1480_v4 = vsel %vm3815_vm12, %v1471_v34, %v1479_v11  ;;  %v1399_v60 = vmul.f32 %v4079_v57, %v1384_v30  ;;  %vm4439_vm12 = vmmov %vm4437_vm4 }
 0x36c   : > { %v1510_v33 = vrot.slane %v1508_v35, 5  ;;  %v1513_v13 = vrot.slane %v1511_v9, 6  ;;  %1488 = vst [vmem:[#allocation2 + $0xc] sm:$0xf] %v1480_v4  ;;  %v1415_v39 = vadd.f32 %v4085_v32, %v1400_v36  ;;  %3023 = vmatpush3.bf16.msra.mxu0 %v3913_v14  ;;  %3055 = vmatpush3.bf16.msra.mxu1 %v3913_v14 }
 0x36d   : > { %v1501_v10 = vrot.slane %v1499_v24, 5  ;;  %v1504_v62 = vrot.slane %v1502_v12, 6  ;;  %v1414_v44 = vadd.f32 %v4085_v32, %v1399_v60  ;;  %3025 = vmatprep.subr.bf16.mxu0 %v3937_v37  ;;  %3057 = vmatprep.subr.bf16.mxu1 %v3937_v37 }
 0x36e   : > { %v1514_v43 = vor.u32 %v1513_v13, %v1510_v33  ;;  %v1423_v45 = vmax.f32 %v1415_v39, 0.0 }
 0x36f   : > { %v1505_v48 = vor.u32 %v1504_v62, %v1501_v10  ;;  %v1422_v46 = vmax.f32 %v1414_v44, 0.0 }
 0x370   : > { %v1516_v57 = vrot.slane %v1514_v43, 4  ;;  %v2580_v52 = vpack.c.bf16 %v1423_v45, %v1423_v45  ;;  %3027 = vmatpush3.bf16.msra.mxu0 %v3937_v37  ;;  %3059 = vmatpush3.bf16.msra.mxu1 %v3937_v37 }
 0x371   : > { %v1506_v47 = vrot.slane %v1505_v48, 4  ;;  %v1521_v51 = vsel %vm3887_vm1, %v1505_v48, %v1520_v31  ;;  %v2579_v6 = vpack.c.bf16 %v1422_v46, %v1422_v46  ;;  %3029 = vmatprep.subr.bf16.mxu0 %v3947_v41  ;;  %3061 = vmatprep.subr.bf16.mxu1 %v3947_v41  ;;  %vm4436_vm1 = vmmov %vm4431_vm3 }
 0x372   : > { %v1525_v32 = vsel %vm3903_vm2, %v1516_v57, %v1524_v21  ;;  %1522 = vst [vmem:[#allocation2 + $0x10] sm:$0xc] %v1521_v51  ;;  %v1543_v58 = vshll.u32 %v2580_v52, 16  ;;  %v1547_v61 = vshrl.u32 %v2580_v52, 16  ;;  %vm4438_vm7 = vmmov %vm4436_vm1 }
 0x373   : > { %1526 = vst [vmem:[#allocation2 + $0x18] sm:$0x7] %v1525_v32  ;;  %v1515_v14 = vsel %vm3860_vm9, %v1506_v47, %v1514_v43  ;;  %v1534_v49 = vshll.u32 %v2579_v6, 16  ;;  %v1537_v5 = vshrl.u32 %v2579_v6, 16  ;;  %v3236_v54 = vld [vmem:[#allocation2 + $0x8] sm:$0xff]   ;;  %vm4440_vm10 = vmmov %vm4436_vm1 }
 0x374   : > { %1523 = vst [vmem:[#allocation2 + $0x14] sm:$0xf] %v1515_v14  ;;  %v1545_v42 = vrot.slane %v1543_v58, 5  ;;  %v1549_v63 = vrot.slane %v1547_v61, 4  ;;  %1802 = vmatmul.mubr.bf16.gmra.mrb[32].mxu0 %v3236_v54  ;;  %2849 = vmatmul.mubr.bf16.gmra.mrb[32].mxu1 %v3236_v54  ;;  %vm4441_vm9 = vmmov %vm4437_vm4 }
 0x375   : > { %v1536_v16 = vrot.slane %v1534_v49, 5  ;;  %v1539_v8 = vrot.slane %v1537_v5, 4  ;;  %1811 = vmatprep.mubr.bf16.mxu0 %v3480_v1  ;;  %2852 = vmatprep.mubr.msk.bf16.mxu1 %vm4425_vm11, %v3478_v0  ;;  %vm4443_vm2 = vmmov %vm4437_vm4 }
 0x376   : > { %v1550_v37 = vor.u32 %v1549_v63, %v1545_v42  ;;  %3031 = vmatpush3.bf16.msra.mxu0 %v3947_v41  ;;  %3063 = vmatpush3.bf16.msra.mxu1 %v3947_v41  ;;  %vm4444_vm3 = vmmov %vm4436_vm1 }
 0x377   : > { %v1540_v23 = vor.u32 %v1539_v8, %v1536_v16  ;;  %v1556_v19 = vsel %vm3879_vm8, %v1536_v16, %v1555_v7  ;;  %3033 = vmatprep.subr.bf16.mxu0 %v3965_v50  ;;  %3065 = vmatprep.subr.bf16.mxu1 %v3965_v50  ;;  %vm4442_vm8 = vmmov %vm4436_vm1 }
 0x378   : > { %v1551_v11 = vrot.slane %v1550_v37, 4  ;;  %1557 = vst [vmem:[#allocation2 + $0x18] sm:$0x8] %v1556_v19  ;;  %vm4447_vm13 = vmmov %vm4436_vm1 }
 0x379   : > { %v1541_v55 = vrot.slane %v1540_v23, 4  ;;  %vm4448_vm14 = vmmov %vm4443_vm2 }
 0x37a   : > { %v1560_v38 = vsel %vm3926_vm15, %v1551_v11, %v1559_v25  ;;  %3035 = vmatpush3.bf16.msra.mxu0 %v3965_v50  ;;  %3067 = vmatpush3.bf16.msra.mxu1 %v3965_v50  ;;  %vm4446_vm15 = vmmov %vm4443_vm2 }
 0x37b   : > { %v3237_v15 = vld [vmem:[#allocation2 + $0x10] sm:$0xff]   ;;  %1561 = vst [vmem:[#allocation2 + $0x20] sm:$0xf] %v1560_v38  ;;  %v1546_v40 = vsel %vm4434_vm5, %v1541_v55, %v1545_v42  ;;  %3037 = vmatprep.subr.bf16.mxu0 %v3971_v53  ;;  %3069 = vmatprep.subr.bf16.mxu1 %v3971_v53  ;;  %vm4449_vm0 = vmmov %vm4436_vm1 }
 0x37c   : > { %1558 = vst [vmem:[#allocation2 + $0x1c] sm:$0xf] %v1546_v40  ;;  %1812 = vmatmul.mubr.bf16.gmra.mrb[36].mxu0 %v3237_v15  ;;  %2853 = vmatmul.mubr.bf16.gmra.mrb[36].mxu1 %v3237_v15  ;;  %vm4450_vm5 = vmmov %vm4443_vm2 }
 0x37d   : > { %1821 = vmatprep.mubr.bf16.mxu0 %v3480_v1  ;;  %2856 = vmatprep.mubr.msk.bf16.mxu1 %vm4425_vm11, %v3478_v0 }
 0x37e   : > { %3039 = vmatpush3.bf16.msra.mxu0 %v3971_v53  ;;  %3071 = vmatpush3.bf16.msra.mxu1 %v3971_v53 }
 0x37f   : > { %3041 = vmatprep.subr.bf16.mxu0 %v3977_v56  ;;  %3073 = vmatprep.subr.bf16.mxu1 %v3977_v56 }
 0x382   : > { %3043 = vmatpush3.bf16.msra.mxu0 %v3977_v56  ;;  %3075 = vmatpush3.bf16.msra.mxu1 %v3977_v56  ;;  %v3239_v27 = vld [vmem:[#allocation2 + $0x20] ss:$0 sps:$4 sm:$0xff]  }
 0x383   : > { %v3238_v17 = vld [vmem:[#allocation2 + $0x18] sm:$0xff]   ;;  %3045 = vmatprep.subr.bf16.mxu0 %v3983_v59  ;;  %3077 = vmatprep.subr.bf16.mxu1 %v3983_v59 }
 0x384   : > { %1822 = vmatmul.mubr.bf16.gmra.mrb[40].mxu0 %v3238_v17  ;;  %2857 = vmatmul.mubr.bf16.gmra.mrb[40].mxu1 %v3238_v17 }
 0x385   : > { %1831 = vmatprep.mubr.bf16.mxu0 %v3480_v1  ;;  %2860 = vmatprep.mubr.msk.bf16.mxu1 %vm4425_vm11, %v3478_v0  ;;  %vm4445_vm11 = vmmov %vm4443_vm2 }
 0x386   : > { %3047 = vmatpush3.bf16.msra.mxu0 %v3983_v59  ;;  %3079 = vmatpush3.bf16.msra.mxu1 %v3983_v59 }
 0x38c   : > { %1832 = vmatmul.mubr.bf16.gmra.mrb[44].mxu0 %v3239_v27  ;;  %2861 = vmatmul.mubr.bf16.gmra.mrb[44].mxu1 %v3239_v27 }
 0x439   : > { %v1793_v41 = vpop.f32.mrb[28].mxu0  ;;  %v1874_v50 = vpop.f32.mrb[28].mxu1 }
 0x43a   : > { %v1795_v53 = vpop.f32.mrb[29].mxu0  ;;  %v2846_v56 = vpop.f32.mrb[29].mxu1  ;;  %v1927_v2 = vrot.slane %v1874_v50, 2 }
 0x43b   : > { %v1797_v18 = vpop.f32.mrb[30].mxu0  ;;  %v1877_v3 = vpop.f32.mrb[30].mxu1  ;;  %v1915_v28 = vrot.slane %v1795_v53, 1 }
 0x43c   : > { %v1928_v22 = vrot.slane %v1877_v3, 2  ;;  %v1799_v26 = vpop.f32.mrb[31].mxu0  ;;  %v2847_v1 = vpop.f32.mrb[31].mxu1 }
 0x43d   : > { %v1916_v30 = vrot.slane %v1799_v26, 1 }
 0x43e   : > { %v1929_v0 = vsel %vm4435_vm6, %v1927_v2, %v1928_v22  ;;  %vm4451_vm6 = vcmask 1043456  }
 0x43f   : > { %v1917_v34 = vsel %vm4436_vm1, %v1915_v28, %v1916_v30  ;;  %vm4452_vm1 = vmmov %vm4451_vm6 }
 0x440   : > { %v1922_v59 = vadd.f32 %v1917_v34, %v1793_v41 }
 0x442   : > { %v1934_v35 = vadd.f32 %v1929_v0, %v1922_v59 }
 0x444   : > { %v4184_v9 = vadd.f32 %v4181_v29, %v1934_v35 }
 0x446   : > { %2896 = vmatprep.mubr.f32.mxu0 %v4184_v9 }
 0x447   : > { %v1803_v20 = vpop.f32.mrb[32].mxu0  ;;  %v1882_v24 = vpop.f32.mrb[32].mxu1 }
 0x448   : > { %v1930_v12 = vrot.slane %v1882_v24, 2  ;;  %v1805_v36 = vpop.f32.mrb[33].mxu0  ;;  %v2850_v4 = vpop.f32.mrb[33].mxu1 }
 0x449   : > { %v1918_v33 = vrot.slane %v1805_v36, 1  ;;  %v1807_v13 = vpop.f32.mrb[34].mxu0  ;;  %v1885_v60 = vpop.f32.mrb[34].mxu1 }
 0x44a   : > { %v1931_v10 = vsel %vm4437_vm4, %v1928_v22, %v1930_v12  ;;  %v1950_v62 = vrot.slane %v1885_v60, 2  ;;  %v1809_v39 = vpop.f32.mrb[35].mxu0  ;;  %v2851_v43 = vpop.f32.mrb[35].mxu1  ;;  %vm4453_vm4 = vmmov %vm4449_vm0 }
 0x44b   : > { %v1919_v31 = vsel %vm4438_vm7, %v1916_v30, %v1918_v33  ;;  %v1938_v44 = vrot.slane %v1809_v39, 1  ;;  %vm4454_vm7 = vcmask 1041408  }
 0x44c   : > { %v1923_v21 = vadd.f32 %v1919_v31, %v1797_v18  ;;  %v1951_v48 = vsel %vm4439_vm12, %v1930_v12, %v1950_v62  ;;  %vm4455_vm12 = vmmov %vm4454_vm7 }
 0x44d   : > { %v1939_v45 = vsel %vm4440_vm10, %v1918_v33, %v1938_v44 }
 0x44e   : > { %v1935_v57 = vadd.f32 %v1931_v10, %v1923_v21  ;;  %v1945_v46 = vadd.f32 %v1939_v45, %v1803_v20 }
 0x44f   : > { %v1813_v47 = vpop.f32.mrb[36].mxu0  ;;  %v1890_v51 = vpop.f32.mrb[36].mxu1 }
 0x450   : > { %v4192_v52 = vadd.f32 %v4181_v29, %v1935_v57  ;;  %v1957_v32 = vadd.f32 %v1951_v48, %v1945_v46  ;;  %v1952_v6 = vrot.slane %v1890_v51, 2  ;;  %v1815_v14 = vpop.f32.mrb[37].mxu0  ;;  %v2854_v58 = vpop.f32.mrb[37].mxu1 }
 0x451   : > { %v1940_v61 = vrot.slane %v1815_v14, 1  ;;  %v1817_v49 = vpop.f32.mrb[38].mxu0  ;;  %v1893_v5 = vpop.f32.mrb[38].mxu1 }
 0x452   : > { %v1953_v54 = vsel %vm4441_vm9, %v1950_v62, %v1952_v6  ;;  %v1974_v42 = vrot.slane %v1893_v5, 2  ;;  %v1819_v63 = vpop.f32.mrb[39].mxu0  ;;  %v2855_v7 = vpop.f32.mrb[39].mxu1  ;;  %2897 = vmatmul.mubr.f32.vlgmr.msra.gmra.mrb[48].mxu0 %v4192_v52  ;;  %v2010_v15 = vrot.slane %v1957_v32, 2 }
 0x453   : > { %v1941_v16 = vsel %vm4442_vm8, %v1938_v44, %v1940_v61  ;;  %v1947_v8 = vadd.f32 %v1940_v61, %v1813_v47  ;;  %v1962_v37 = vrot.slane %v1819_v63, 1 }
 0x454   : > { %v1946_v25 = vadd.f32 %v1941_v16, %v1807_v13  ;;  %v1975_v23 = vsel %vm4443_vm2, %v1952_v6, %v1974_v42 }
 0x455   : > { %v1959_v19 = vadd.f32 %v1952_v6, %v1947_v8  ;;  %v1963_v11 = vsel %vm4444_vm3, %v1940_v61, %v1962_v37 }
 0x456   : > { %v1958_v55 = vadd.f32 %v1953_v54, %v1946_v25  ;;  %v1969_v38 = vadd.f32 %v1963_v11, %v1813_v47 }
 0x457   : > { %v1823_v40 = vpop.f32.mrb[40].mxu0  ;;  %v1898_v17 = vpop.f32.mrb[40].mxu1  ;;  %v2013_v41 = vrot.slane %v1959_v19, 2 }
 0x458   : > { %v2011_v27 = vrot.slane %v1958_v55, 2  ;;  %v1981_v50 = vadd.f32 %v1975_v23, %v1969_v38  ;;  %v1976_v53 = vrot.slane %v1898_v17, 2  ;;  %v1825_v56 = vpop.f32.mrb[41].mxu0  ;;  %v2858_v18 = vpop.f32.mrb[41].mxu1 }
 0x459   : > { %v1964_v3 = vrot.slane %v1825_v56, 1  ;;  %v1827_v2 = vpop.f32.mrb[42].mxu0  ;;  %v1901_v22 = vpop.f32.mrb[42].mxu1 }
 0x45a   : > { %v1977_v26 = vsel %vm4445_vm11, %v1974_v42, %v1976_v53  ;;  %v1829_v1 = vpop.f32.mrb[43].mxu0  ;;  %v2859_v28 = vpop.f32.mrb[43].mxu1  ;;  %v2012_v30 = vsel %vm4446_vm15, %v2010_v15, %v2011_v27  ;;  %v2014_v24 = vsel %vm4448_vm14, %v2011_v27, %v2013_v41  ;;  %v1998_v13 = vrot.slane %v1901_v22, 2 }
 0x45b   : > { %v1965_v0 = vsel %vm4447_vm13, %v1962_v37, %v1964_v3  ;;  %v1971_v34 = vadd.f32 %v1964_v3, %v1823_v40  ;;  %v1986_v59 = vrot.slane %v1829_v1, 1  ;;  %v2046_v35 = vadd.f32 %v4181_v29, %v2012_v30 }
 0x45c   : > { %v1970_v20 = vadd.f32 %v1965_v0, %v1817_v49  ;;  %v2047_v4 = vadd.f32 %v4181_v29, %v2014_v24  ;;  %v2020_v43 = vrot.slane %v1981_v50, 4 }
 0x45d   : > { %v1983_v12 = vadd.f32 %v1976_v53, %v1971_v34  ;;  %v1987_v36 = vsel %vm4449_vm0, %v1964_v3, %v1986_v59  ;;  %2899 = vmatprep.mubr.f32.mxu0 %v2046_v35 }
 0x45e   : > { %v1982_v33 = vadd.f32 %v1977_v26, %v1970_v20  ;;  %v1993_v60 = vadd.f32 %v1987_v36, %v1823_v40  ;;  %2900 = vmatmul.mubr.f32.gmra.mrb[50].mxu0 %v2047_v4 }
 0x45f   : > { %v2023_v10 = vrot.slane %v1983_v12, 4  ;;  %v1833_v62 = vpop.f32.mrb[44].mxu0  ;;  %v1906_v39 = vpop.f32.mrb[44].mxu1 }
 0x460   : > { %v2021_v31 = vrot.slane %v1982_v33, 4  ;;  %v2004_v44 = vadd.f32 %v1998_v13, %v1993_v60  ;;  %v1999_v21 = vrot.slane %v1906_v39, 2  ;;  %v1835_v48 = vpop.f32.mrb[45].mxu0  ;;  %v2862_v45 = vpop.f32.mrb[45].mxu1  ;;  %v4242_v39 = vld [vmem:[%s4456_s19] ss:$0 sm:$0xff] }
 0x461   : > { %v1988_v57 = vrot.slane %v1835_v48, 1  ;;  %v1837_v46 = vpop.f32.mrb[46].mxu0  ;;  %v1909_v47 = vpop.f32.mrb[46].mxu1 }
 0x462   : > { %v2000_v51 = vsel %vm4450_vm5, %v1998_v13, %v1999_v21  ;;  %v1838_v32 = vpop.f32.mrb[47].mxu0  ;;  %v2863_v6 = vpop.f32.mrb[47].mxu1  ;;  %v2022_v14 = vsel %vm4451_vm6, %v2020_v43, %v2021_v31  ;;  %v2024_v58 = vsel %vm4452_vm1, %v2021_v31, %v2023_v10  ;;  %v2030_v8 = vrot.slane %v2004_v44, 6 }
 0x463   : > { %v1989_v61 = vsel %vm4453_vm4, %v1986_v59, %v1988_v57  ;;  %v1995_v49 = vadd.f32 %v1988_v57, %v1833_v62  ;;  %v2048_v5 = vadd.f32 %v4181_v29, %v2022_v14  ;;  %v2049_v54 = vadd.f32 %v4181_v29, %v2024_v58  ;;  %v3272_v57 = vld [vmem:[%s3744_s11 + $0x8] sm:$0xff] }
 0x464   : > { %v1994_v42 = vadd.f32 %v1989_v61, %v1827_v2 }
 0x465   : > { %v2006_v63 = vadd.f32 %v1999_v21, %v1995_v49  ;;  %2902 = vmatprep.mubr.f32.mxu0 %v2048_v5 }
 0x466   : > { %v2005_v7 = vadd.f32 %v2000_v51, %v1994_v42  ;;  %2903 = vmatmul.mubr.f32.gmra.mrb[52].mxu0 %v2049_v54  ;;  %v3273_v51 = vld [vmem:[%s3744_s11] sm:$0xff] }
 0x467   : > { %v2033_v16 = vrot.slane %v2006_v63, 6 }
 0x468   : > { %v2031_v37 = vrot.slane %v2005_v7, 6 }
 0x46a   : > { %v2032_v25 = vsel %vm4454_vm7, %v2030_v8, %v2031_v37  ;;  %v2034_v23 = vsel %vm4455_vm12, %v2031_v37, %v2033_v16 }
 0x46b   : > { %v2050_v19 = vadd.f32 %v4181_v29, %v2032_v25  ;;  %v2051_v11 = vadd.f32 %v4181_v29, %v2034_v23 }
 0x46d   : > { %2905 = vmatprep.mubr.f32.mxu0 %v2050_v19 }
 0x46e   : > { %2906 = vmatmul.mubr.f32.gmra.mrb[54].mxu0 %v2051_v11 }
 0x525   : > { %v2898_v55 = vpop.f32.mrb[48].mxu0 }
 0x526   : > { %v2158_v38 = vsub.f32 %v4192_v52, %v2898_v55  ;;  %v2118_v15 = vpop.f32.mrb[49].mxu0 }
 0x527   : > { %v2157_v40 = vsub.f32 %v4184_v9, %v2118_v15 }
 0x528   : > { %v2166_v27 = vmul.f32 %v2158_v38, %v2158_v38 }
 0x529   : > { %v2165_v17 = vmul.f32 %v2157_v40, %v2157_v40 }
 0x52b   : > { %2940 = vmatprep.mubr.f32.mxu1 %v2165_v17  ;;  %v3275_v17 = vld [vmem:[%s3744_s11 + $0x10] sm:$0xff] }
 0x52c   : > { %2941 = vmatmul.mubr.f32.vlgmr.msra.gmra.mrb[48].mxu1 %v2166_v27 }
 0x531   : > { %v2901_v41 = vpop.f32.mrb[50].mxu0 }
 0x532   : > { %v2160_v50 = vsub.f32 %v2047_v4, %v2901_v41  ;;  %v2128_v53 = vpop.f32.mrb[51].mxu0  ;;  %v4237_v4 = vld [vmem:[%s4342_s7] ss:$0 sm:$0xff] }
 0x533   : > { %v2159_v56 = vsub.f32 %v2046_v35, %v2128_v53 }
 0x534   : > { %v2168_v3 = vmul.f32 %v2160_v50, %v2160_v50 }
 0x535   : > { %v2167_v18 = vmul.f32 %v2159_v56, %v2159_v56 }
 0x537   : > { %2943 = vmatprep.mubr.f32.mxu1 %v2167_v18 }
 0x538   : > { %2944 = vmatmul.mubr.f32.gmra.mrb[50].mxu1 %v2168_v3 }
 0x539   : > { %v2904_v29 = vpop.f32.mrb[52].mxu0 }
 0x53a   : > { %v4218_v2 = vsub.f32 %v2049_v54, %v2904_v29  ;;  %v2138_v22 = vpop.f32.mrb[53].mxu0 }
 0x53b   : > { %v4220_v52 = vsub.f32 %v2048_v5, %v2138_v22 }
 0x53c   : > { %v2170_v26 = vmul.f32 %v4218_v2, %v4218_v2 }
 0x53d   : > { %v2169_v9 = vmul.f32 %v4220_v52, %v4220_v52 }
 0x53f   : > { %2946 = vmatprep.mubr.f32.mxu1 %v2169_v9  ;;  %v3276_v9 = vld [vmem:[%s3744_s11 + $0x28] sm:$0xff] }
 0x540   : > { %2947 = vmatmul.mubr.f32.gmra.mrb[52].mxu1 %v2170_v26 }
 0x541   : > { %v2907_v1 = vpop.f32.mrb[54].mxu0 }
 0x542   : > { %v4226_v28 = vsub.f32 %v2051_v11, %v2907_v1  ;;  %v2148_v30 = vpop.f32.mrb[55].mxu0 }
 0x543   : > { %v4228_v0 = vsub.f32 %v2050_v19, %v2148_v30 }
 0x544   : > { %v2172_v59 = vmul.f32 %v4226_v28, %v4226_v28 }
 0x545   : > { %v2171_v34 = vmul.f32 %v4228_v0, %v4228_v0 }
 0x547   : > { %2949 = vmatprep.mubr.f32.mxu1 %v2171_v34 }
 0x548   : > { %2950 = vmatmul.mubr.f32.gmra.mrb[54].mxu1 %v2172_v59 }
 0x5ff   : > { %v2942_v35 = vpop.f32.mrb[48].mxu1 }
 0x600   : > { %v2245_v20 = vadd.f32 1e-05, %v2942_v35  ;;  %v2239_v24 = vpop.f32.mrb[49].mxu1 }
 0x601   : > { %v2240_v12 = vadd.f32 1e-05, %v2239_v24 }
 0x602   : > { %3256 = vrsqrt.f32 %v2245_v20 }
 0x603   : > { %3258 = vrsqrt.f32 %v2240_v12 }
 0x60b   : > { %v2945_v33 = vpop.f32.mrb[50].mxu1 }
 0x60c   : > { %v3257_v36 = vpop.eup %3256  ;;  %v2255_v10 = vadd.f32 1e-05, %v2945_v33  ;;  %v2249_v62 = vpop.f32.mrb[51].mxu1 }
 0x60d   : > { %v3259_v13 = vpop.eup %3258  ;;  %v2287_v60 = vmul.f32 %v3257_v36, %v2158_v38  ;;  %v2250_v31 = vadd.f32 1e-05, %v2249_v62  ;;  %v3274_v38 = vld [vmem:[%s3744_s11 + $0x18] sm:$0xff] }
 0x60e   : > { %v2286_v43 = vmul.f32 %v3259_v13, %v2157_v40  ;;  %3260 = vrsqrt.f32 %v2255_v10 }
 0x60f   : > { %v2302_v44 = vmul.f32 %v4237_v4, %v2287_v60  ;;  %3262 = vrsqrt.f32 %v2250_v31  ;;  %v3279_v60 = vld [vmem:[%s3744_s11 + $0x30] sm:$0xff] }
 0x610   : > { %v2301_v21 = vmul.f32 %v4237_v4, %v2286_v43 }
 0x611   : > { %v2317_v48 = vadd.f32 %v4242_v39, %v2302_v44 }
 0x612   : > { %v2316_v45 = vadd.f32 %v4242_v39, %v2301_v21 }
 0x613   : > { %v2325_v46 = vadd.f32 %v3272_v57, %v2317_v48  ;;  %v2948_v47 = vpop.f32.mrb[52].mxu1 }
 0x614   : > { %v2324_v32 = vadd.f32 %v3273_v51, %v2316_v45  ;;  %v2265_v6 = vadd.f32 1e-05, %v2948_v47  ;;  %v2259_v14 = vpop.f32.mrb[53].mxu1 }
 0x615   : > { %v2333_v58 = vmax.f32 %v2325_v46, 0.0  ;;  %v2260_v61 = vadd.f32 1e-05, %v2259_v14 }
 0x616   : > { %v2332_v49 = vmax.f32 %v2324_v32, 0.0  ;;  %3264 = vrsqrt.f32 %v2265_v6 }
 0x617   : > { %2341 = vst [vmem:[%s4252_s21 + $0x8] sm:$0xff] %v2333_v58  ;;  %3266 = vrsqrt.f32 %v2260_v61 }
 0x618   : > { %2340 = vst [vmem:[%s4252_s21] sm:$0xff] %v2332_v49  ;;  %v3261_v5 = vpop.eup %3260 }
 0x619   : > { %v3263_v54 = vpop.eup %3262  ;;  %v2289_v42 = vmul.f32 %v3261_v5, %v2160_v50 }
 0x61a   : > { %v2288_v63 = vmul.f32 %v3263_v54, %v2159_v56 }
 0x61b   : > { %v2951_v7 = vpop.f32.mrb[54].mxu1  ;;  %v2304_v16 = vmul.f32 %v4237_v4, %v2289_v42 }
 0x61c   : > { %v2275_v8 = vadd.f32 1e-05, %v2951_v7  ;;  %v2269_v37 = vpop.f32.mrb[55].mxu1  ;;  %v2303_v25 = vmul.f32 %v4237_v4, %v2288_v63 }
 0x61d   : > { %v2270_v23 = vadd.f32 1e-05, %v2269_v37  ;;  %v2319_v19 = vadd.f32 %v4242_v39, %v2304_v16 }
 0x61e   : > { %3268 = vrsqrt.f32 %v2275_v8  ;;  %v2318_v11 = vadd.f32 %v4242_v39, %v2303_v25 }
 0x61f   : > { %3270 = vrsqrt.f32 %v2270_v23  ;;  %v2327_v15 = vadd.f32 %v3274_v38, %v2319_v19 }
 0x620   : > { %v3265_v55 = vpop.eup %3264  ;;  %v2326_v27 = vadd.f32 %v3275_v17, %v2318_v11 }
 0x621   : > { %v3267_v40 = vpop.eup %3266  ;;  %v2291_v41 = vmul.f32 %v3265_v55, %v4218_v2  ;;  %v2335_v50 = vmax.f32 %v2327_v15, 0.0 }
 0x622   : > { %v2290_v53 = vmul.f32 %v3267_v40, %v4220_v52  ;;  %v2334_v56 = vmax.f32 %v2326_v27, 0.0  ;;  %v3277_v52 = vld [vmem:[%s3744_s11 + $0x20] sm:$0xff] }
 0x623   : > { %v2306_v18 = vmul.f32 %v4237_v4, %v2291_v41  ;;  %2343 = vst [vmem:[%s4252_s21 + $0x18] sm:$0xff] %v2335_v50 }
 0x624   : > { %v2305_v3 = vmul.f32 %v4237_v4, %v2290_v53  ;;  %2342 = vst [vmem:[%s4252_s21 + $0x10] sm:$0xff] %v2334_v56 }
 0x625   : > { %v2321_v29 = vadd.f32 %v4242_v39, %v2306_v18 }
 0x626   : > { %v2320_v22 = vadd.f32 %v4242_v39, %v2305_v3 }
 0x627   : > { %v2329_v26 = vadd.f32 %v3276_v9, %v2321_v29 }
 0x628   : > { %v3269_v2 = vpop.eup %3268  ;;  %v2328_v1 = vadd.f32 %v3277_v52, %v2320_v22 }
 0x629   : > { %v3271_v30 = vpop.eup %3270  ;;  %v2337_v34 = vmax.f32 %v2329_v26, 0.0  ;;  %v2293_v59 = vmul.f32 %v3269_v2, %v4226_v28  ;;  %v3278_v28 = vld [vmem:[%s3744_s11 + $0x38] sm:$0xff]  ;;  %s3481_s11 = smov [#allocation11]  }
 0x62a   : > { %v2336_v35 = vmax.f32 %v2328_v1, 0.0  ;;  %v2292_v20 = vmul.f32 %v3271_v30, %v4228_v0  ;;  %s3398_s18 = sshll.u32 %s3481_s11, 4  ;;  %s3399_s18 = int_to_ptr.vmem [resolvable:$false] %s3398_s18 }
 0x62b   : > { %2345 = vst [vmem:[%s4252_s21 + $0x28] sm:$0xff] %v2337_v34  ;;  %v2308_v24 = vmul.f32 %v4237_v4, %v2293_v59  ;;  %s3400_s28 = scalar_lea.vmem %s3399_s18, 2048  ;;  %p3401_p12 = scmp.lt.s32.totalorder %s4289_s26, %s3399_s18 }
 0x62c   : > { %2344 = vst [vmem:[%s4252_s21 + $0x20] sm:$0xff] %v2336_v35  ;;  %v2307_v12 = vmul.f32 %v4237_v4, %v2292_v20  ;;  %p3402_p2 = scmp.lt.s32.totalorder %s3400_s28, %s3394_s12 }
 0x62d   : > { %v2323_v36 = vadd.f32 %v4242_v39, %v2308_v24 }
 0x62e   : > { %v2322_v33 = vadd.f32 %v4242_v39, %v2307_v12  ;;  %p3403_p1 = por %p3402_p2, %p3401_p12 }
 0x62f   : > { %v2331_v13 = vadd.f32 %v3278_v28, %v2323_v36 }
 0x630   : > { %v2330_v0 = vadd.f32 %v3279_v60, %v2322_v33  ;;  %p3404_p4 = pnand %p3403_p1, %p3397_p7 }
 0x631   : > { %v2339_v10 = vmax.f32 %v2331_v13, 0.0 }
 0x632   : > { %v2338_v4 = vmax.f32 %v2330_v0, 0.0 }
 0x633   : > { %2347 = vst [vmem:[%s4252_s21 + $0x38] sm:$0xff] %v2339_v10 }
 0x634   : > { %2346 = vst [vmem:[%s4252_s21 + $0x30] sm:$0xff] %v2338_v4 }
 0x635   : > { %3407 = shalt.err (!%p3404_p4)
}
 0x636   : > { %s3408_s27 = scalar_lea.hbm %s4287_s10, 1024  ;;  %s3412_s21 = scalar_lea.hbm %s4457_s30, 2048 }
 0x637   : > { %p3409_p9 = scmp.ne.s32.totalorder %s4287_s10, %s3408_s27  ;;  %p3413_p8 = scmp.lt.u32.totalorder %s4287_s10, %s4457_s30 }
 0x638   : > { %p3414_p13 = scmp.lt.u32.totalorder %s3412_s21, %s3408_s27  ;;  %p3416_p10 = scmp.lt.u32.totalorder %s3408_s27, %s4287_s10 }
 0x639   : > { %p3410_p0 = pnand %p3409_p9, %p3687_p5 }
 0x63a   : > { %p3415_p6 = por %p3414_p13, %p3413_p8 }
 0x63b   : > { %p3411_p11 = pneg %p3410_p0 }
 0x63c   : > { %p3417_p3 = por %p3416_p10, %p3415_p6 }
 0x63e   : > { %p3418_p7 = pnand %p3417_p3, %p3411_p11 }
 0x640   : > { %3421 = shalt.err (!%p3418_p7)
}
 0x641   : > { %s3482_s29 = smov 128   ;;  %s3483_s12 = smov 8  }
 0x642   : > { %3094 = dma.vmem_to_hbm [thread:$0]  (%p3687_p5), %s4289_s26, 1024, %s4287_s10, %s2349_s17, %s3482_s29, %s3482_s29, %s3483_s12  }
 0x643 PF: > { %s4458_s11 = sld [smem:[#allocation16_spill]]  ;;  %s4459_s18 = sld [smem:[#allocation17_spill]] }
 0x644   : > { %p4461_p2 = scmp.ge.s32.totalorder %s3468_s16, 2 }
 0x649   : > { %s2377_s28 = sand.u32 1, %s4458_s11   ;;  %p4460_p12 = scmp.ne.s32.totalorder %s4459_s18, 0 }
 0x64a   : > { %s2378_s27 = scalar_lea.sflag [#allocation5], %s2377_s28 }
 0x64b   : > { %p3111_p1 = pnand %p4461_p2, %p4460_p12 }
 0x64d   : > { %3451 = dma.done.wait (!%p3111_p1), %s2378_s27, 1024  }
 0x64e   : > { %3453 = vsyncadd (!%p3111_p1), %s2378_s27, 4294966272  ;;  %p25_p4 = scmp.ge.s32.totalorder %s3673_s8, 4   ;;  %s4462_s13 = smov %s3460_s14 }
 0x64f   : > { %s4463_s14 = smov %s3464_s15  ;;  %s4464_s15 = smov %s3683_s20 }
 0x650   : > { %s4465_s16 = smov %s3673_s8  ;;  %27 = sbr.rel (!%p25_p4) target bundleno = 10 (0xa), region = 117 }
 0x657   :  { %2383 = vsyncpa [#allocation4], 1 }
 0x658   :  { %2385 = vsyncpa [#allocation4 + $0x1], 1 }
 0x659   :  { %2386 = vsyncpa [#allocation7], 1 }
 0x65a   :  { %2387 = vsyncpa [#allocation10], 1 }
 0x65b   :  { %2388 = vsyncpa [#allocation5], 1 }
 0x65c   :  { %2390 = vsyncpa [#allocation5 + $0x1], 1 }

</bundles_post_ra>
